<compile_context>
chip_gen: v5e
topology: v5e:2x2
jax: 0.10.0
libtpu: 0.0.40
codegen_flags: <defaults>
</compile_context>

<pallas_src>
import numpy as np

import jax
import jax.numpy as jnp
from jax.experimental import pallas as pl
from jax.experimental.pallas import tpu as pltpu

TB = 8  # batch tile (images per grid step); batch is padded to a multiple of TB


# ---------------------------------------------------------------------------
# Fused forward kernel: processes TB images per grid step.
# Activation layout inside the kernel: rows = H, columns = W*C (c fastest).
# ---------------------------------------------------------------------------
def _cifar_fwd_kernel(x_ref, w1e_ref, w1o_ref, b1_ref, r1e_ref, r1o_ref,
                      w2e_ref, w2o_ref, b2_ref, r2e_ref, r2o_ref,
                      wf1_ref, bf1_ref, wf2_ref, bf2_ref, wf3_ref, bf3_ref,
                      out_ref):
    f32 = jnp.float32

    def one_image(img, carry):
        xi = x_ref[img]                                        # (32, 96) = H x (W*Cin)

        # ---- conv1 (5x5, 3->6) + bias + ReLU, width half of maxpool fused --
        acc_e = jnp.zeros((28, 84), f32)
        acc_o = jnp.zeros((28, 84), f32)
        for ki in range(5):                                    # shifted banded matmuls
            xk = xi[ki:ki + 28, :]                             # (28, 96)
            acc_e = acc_e + jnp.dot(xk, w1e_ref[ki], preferred_element_type=f32)
            acc_o = acc_o + jnp.dot(xk, w1o_ref[ki], preferred_element_type=f32)
        t1 = jnp.maximum(jnp.maximum(acc_e, acc_o) + b1_ref[...], 0.0)   # (28, 84)
        # height half of maxpool: 0/1 row-selection matmuls + elementwise max
        p1 = jnp.maximum(jnp.dot(r1e_ref[...], t1, preferred_element_type=f32),
                         jnp.dot(r1o_ref[...], t1, preferred_element_type=f32))  # (14, 84)

        # ---- conv2 (5x5, 6->16) + bias + ReLU, width half of maxpool fused -
        acc_e = jnp.zeros((10, 80), f32)
        acc_o = jnp.zeros((10, 80), f32)
        for ki in range(5):
            pk = p1[ki:ki + 10, :]                             # (10, 84)
            acc_e = acc_e + jnp.dot(pk, w2e_ref[ki], preferred_element_type=f32)
            acc_o = acc_o + jnp.dot(pk, w2o_ref[ki], preferred_element_type=f32)
        t2 = jnp.maximum(jnp.maximum(acc_e, acc_o) + b2_ref[...], 0.0)   # (10, 80)
        p2 = jnp.maximum(jnp.dot(r2e_ref[...], t2, preferred_element_type=f32),
                         jnp.dot(r2o_ref[...], t2, preferred_element_type=f32))  # (5, 80)

        # ---- fc1: CHW flatten folded into per-row weight slabs --------------
        f1 = bf1_ref[...]                                      # (1, 120)
        for h in range(5):
            f1 = f1 + jnp.dot(p2[h:h + 1, :], wf1_ref[h], preferred_element_type=f32)
        f1 = jnp.maximum(f1, 0.0)

        # ---- fc2 / fc3 ------------------------------------------------------
        f2 = jnp.maximum(jnp.dot(f1, wf2_ref[...], preferred_element_type=f32)
                         + bf2_ref[...], 0.0)                  # (1, 84)
        f3 = jnp.dot(f2, wf3_ref[...], preferred_element_type=f32) + bf3_ref[...]  # (1, 10)

        out_ref[pl.ds(img, 1), :] = f3
        return carry

    jax.lax.fori_loop(0, TB, one_image, 0)


# ---------------------------------------------------------------------------
# Weight preparation (wrapper-side, tiny; traced under jit).
# ---------------------------------------------------------------------------
def _conv_pool_weights(w, w_in):
    """w: (Cout, Cin, KH, KW) PyTorch conv weight.

    Returns (even, odd), each (KH, W_in*Cin, (W_out//2)*Cout): banded matmul
    weights so that  sum_ki  x[h+ki, :] @ even_ki  computes the conv output at
    the EVEN output columns (and `odd` at the odd ones), i.e. the width-axis
    selection of the following 2x2 maxpool is folded into the weights."""
    cout, cin, kh, kw = w.shape
    w_out = w_in - kw + 1
    off = jnp.arange(w_in)[:, None] - jnp.arange(w_out)[None, :]   # (w_in, w_out)
    valid = (off >= 0) & (off < kw)
    offc = jnp.clip(off, 0, kw - 1)
    evens, odds = [], []
    for ki in range(kh):
        wk = w[:, :, ki, :]                            # (cout, cin, kw)
        g = wk[:, :, offc]                             # (cout, cin, w_in, w_out)
        g = jnp.where(valid[None, None, :, :], g, 0.0)
        g = jnp.transpose(g, (2, 1, 3, 0))             # (w_in, cin, w_out, cout)
        ge = g[:, :, 0::2, :].reshape(w_in * cin, (w_out // 2) * cout)
        go = g[:, :, 1::2, :].reshape(w_in * cin, (w_out // 2) * cout)
        evens.append(ge)
        odds.append(go)
    return jnp.stack(evens, 0), jnp.stack(odds, 0)


def _row_pool_selectors(h_out):
    """0/1 selection matrices (h_out//2, h_out) picking even / odd rows."""
    hh = h_out // 2
    cols = jnp.arange(h_out)[None, :]
    rows = jnp.arange(hh)[:, None]
    re = (cols == 2 * rows).astype(jnp.float32)
    ro = (cols == 2 * rows + 1).astype(jnp.float32)
    return re, ro


# ---------------------------------------------------------------------------
# Forward pass.
# ---------------------------------------------------------------------------
@jax.jit
def forward(params, x):
    n = x.shape[0]
    # NCHW -> row-flattened NHWC: (N, H, W*C)
    x2 = jnp.transpose(x, (0, 2, 3, 1)).reshape(n, 32, 32 * 3).astype(jnp.float32)
    n_pad = ((n + TB - 1) // TB) * TB
    if n_pad != n:
        x2 = jnp.pad(x2, ((0, n_pad - n), (0, 0), (0, 0)))

    w1e, w1o = _conv_pool_weights(params["conv1_w"], 32)        # (5, 96, 84)
    w2e, w2o = _conv_pool_weights(params["conv2_w"], 14)        # (5, 84, 80)
    b1c = jnp.tile(params["conv1_b"], 14)[None, :]               # (1, 84)
    b2c = jnp.tile(params["conv2_b"], 5)[None, :]                # (1, 80)
    r1e, r1o = _row_pool_selectors(28)                           # (14, 28)
    r2e, r2o = _row_pool_selectors(10)                           # (5, 10)
    # fc1: permute columns from CHW order to (H, W*C) slabs (free, wrapper-side)
    wf1 = params["fc1_w"].reshape(120, 16, 5, 5).transpose(2, 3, 1, 0).reshape(5, 80, 120)
    bf1 = params["fc1_b"][None, :]
    wf2 = params["fc2_w"].T
    bf2 = params["fc2_b"][None, :]
    wf3 = params["fc3_w"].T
    bf3 = params["fc3_b"][None, :]

    def full3(shape):
        return pl.BlockSpec(shape, lambda b: (0, 0, 0))

    def full2(shape):
        return pl.BlockSpec(shape, lambda b: (0, 0))

    flops_per_img = 2 * (2 * 5 * 28 * 96 * 84 + 2 * 14 * 28 * 84
                         + 2 * 5 * 10 * 84 * 80 + 2 * 5 * 10 * 80
                         + 5 * 80 * 120 + 120 * 84 + 84 * 10)
    bytes_accessed = 4 * (x2.size + w1e.size + w1o.size + w2e.size + w2o.size
                          + wf1.size + wf2.size + wf3.size + n_pad * 10)

    out = pl.pallas_call(
        _cifar_fwd_kernel,
        out_shape=jax.ShapeDtypeStruct((n_pad, 10), jnp.float32),
        grid=(n_pad // TB,),
        in_specs=[
            pl.BlockSpec((TB, 32, 96), lambda b: (b, 0, 0)),     # activations
            full3((5, 96, 84)), full3((5, 96, 84)), full2((1, 84)),   # conv1
            full2((14, 28)), full2((14, 28)),                         # pool1 rows
            full3((5, 84, 80)), full3((5, 84, 80)), full2((1, 80)),   # conv2
            full2((5, 10)), full2((5, 10)),                           # pool2 rows
            full3((5, 80, 120)), full2((1, 120)),                     # fc1
            full2((120, 84)), full2((1, 84)),                         # fc2
            full2((84, 10)), full2((1, 10)),                          # fc3
        ],
        out_specs=pl.BlockSpec((TB, 10), lambda b: (b, 0)),
        compiler_params=pltpu.CompilerParams(dimension_semantics=("parallel",)),
        cost_estimate=pl.CostEstimate(flops=flops_per_img * n_pad,
                                      transcendentals=0,
                                      bytes_accessed=bytes_accessed),
    )(x2, w1e, w1o, b1c, r1e, r1o, w2e, w2o, b2c, r2e, r2o,
      wf1, bf1, wf2, bf2, wf3, bf3)
    return out[:n]


# ---------------------------------------------------------------------------
# Deterministic parameters (shapes from the module __init__).
# ---------------------------------------------------------------------------
def init_params(key):
    ks = jax.random.split(key, 10)

    def normal(k, shape, scale=0.05):
        return scale * jax.random.normal(k, shape, dtype=jnp.float32)

    return {
        "conv1_w": normal(ks[0], (6, 3, 5, 5)),
        "conv1_b": normal(ks[1], (6,)),
        "conv2_w": normal(ks[2], (16, 6, 5, 5)),
        "conv2_b": normal(ks[3], (16,)),
        "fc1_w":   normal(ks[4], (120, 400)),   # PyTorch Linear: (out, in)
        "fc1_b":   normal(ks[5], (120,)),
        "fc2_w":   normal(ks[6], (84, 120)),
        "fc2_b":   normal(ks[7], (84,)),
        "fc3_w":   normal(ks[8], (10, 84)),
        "fc3_b":   normal(ks[9], (10,)),
    }


# ---------------------------------------------------------------------------
# Pure-JAX reference (for correctness checking only).
# ---------------------------------------------------------------------------
def forward_reference(params, x):
    hp = jax.lax.Precision.HIGHEST
    dn = ("NCHW", "OIHW", "NCHW")
    y = jax.lax.conv_general_dilated(x, params["conv1_w"], (1, 1), "VALID",
                                     dimension_numbers=dn, precision=hp)
    y = jnp.maximum(y + params["conv1_b"][None, :, None, None], 0.0)
    y = y.reshape(y.shape[0], 6, 14, 2, 14, 2).max(axis=(3, 5))
    y = jax.lax.conv_general_dilated(y, params["conv2_w"], (1, 1), "VALID",
                                     dimension_numbers=dn, precision=hp)
    y = jnp.maximum(y + params["conv2_b"][None, :, None, None], 0.0)
    y = y.reshape(y.shape[0], 16, 5, 2, 5, 2).max(axis=(3, 5))
    y = y.reshape(y.shape[0], 400)                       # CHW flatten, as in PyTorch
    y = jnp.maximum(jnp.dot(y, params["fc1_w"].T, precision=hp) + params["fc1_b"], 0.0)
    y = jnp.maximum(jnp.dot(y, params["fc2_w"].T, precision=hp) + params["fc2_b"], 0.0)
    return jnp.dot(y, params["fc3_w"].T, precision=hp) + params["fc3_b"]


if __name__ == "__main__":
    root = jax.random.PRNGKey(0)
    kx, kp = jax.random.split(root)
    params = init_params(kp)
    x = jax.random.normal(kx, (2, 3, 32, 32), dtype=jnp.float32)   # CIFAR-shaped input

    out = jax.block_until_ready(forward(params, x))
    assert out.shape == (2, 10), out.shape

    ref = jax.block_until_ready(jax.jit(forward_reference)(params, x))
    np.testing.assert_allclose(np.asarray(out), np.asarray(ref), rtol=2e-2, atol=2e-3)
    print("KERNEL_OK")
</pallas_src>

<mosaic_0001>
module attributes {stable_mosaic.version = 11 : i64} {
  func.func @_cifar_fwd_kernel(%arg0: i32, %arg1: memref<8x32x96xf32, #tpu.memory_space<vmem>>, %arg2: memref<5x96x84xf32, #tpu.memory_space<vmem>>, %arg3: memref<5x96x84xf32, #tpu.memory_space<vmem>>, %arg4: memref<1x84xf32, #tpu.memory_space<vmem>>, %arg5: memref<14x28xf32, #tpu.memory_space<vmem>>, %arg6: memref<14x28xf32, #tpu.memory_space<vmem>>, %arg7: memref<5x84x80xf32, #tpu.memory_space<vmem>>, %arg8: memref<5x84x80xf32, #tpu.memory_space<vmem>>, %arg9: memref<1x80xf32, #tpu.memory_space<vmem>>, %arg10: memref<5x10xf32, #tpu.memory_space<vmem>>, %arg11: memref<5x10xf32, #tpu.memory_space<vmem>>, %arg12: memref<5x80x120xf32, #tpu.memory_space<vmem>>, %arg13: memref<1x120xf32, #tpu.memory_space<vmem>>, %arg14: memref<120x84xf32, #tpu.memory_space<vmem>>, %arg15: memref<1x84xf32, #tpu.memory_space<vmem>>, %arg16: memref<84x10xf32, #tpu.memory_space<vmem>>, %arg17: memref<1x10xf32, #tpu.memory_space<vmem>>, %arg18: memref<8x10xf32, #tpu.memory_space<vmem>>) attributes {dimension_semantics = [#tpu.dimension_semantics<parallel>], iteration_bounds = array<i64: 1>, scalar_prefetch = 0 : i64, scratch_operands = 0 : i64, tpu.core_type = #tpu.core_type<tc>, window_params = [{transform_indices = @transform_0, window_bounds = array<i64: 8, 32, 96>}, {pipeline_mode = #tpu.pipeline_mode<synchronous>, transform_indices = @transform_1, window_bounds = array<i64: 5, 96, 84>}, {pipeline_mode = #tpu.pipeline_mode<synchronous>, transform_indices = @transform_2, window_bounds = array<i64: 5, 96, 84>}, {pipeline_mode = #tpu.pipeline_mode<synchronous>, transform_indices = @transform_3, window_bounds = array<i64: 1, 84>}, {pipeline_mode = #tpu.pipeline_mode<synchronous>, transform_indices = @transform_4, window_bounds = array<i64: 14, 28>}, {pipeline_mode = #tpu.pipeline_mode<synchronous>, transform_indices = @transform_5, window_bounds = array<i64: 14, 28>}, {pipeline_mode = #tpu.pipeline_mode<synchronous>, transform_indices = @transform_6, window_bounds = array<i64: 5, 84, 80>}, {pipeline_mode = #tpu.pipeline_mode<synchronous>, transform_indices = @transform_7, window_bounds = array<i64: 5, 84, 80>}, {pipeline_mode = #tpu.pipeline_mode<synchronous>, transform_indices = @transform_8, window_bounds = array<i64: 1, 80>}, {pipeline_mode = #tpu.pipeline_mode<synchronous>, transform_indices = @transform_9, window_bounds = array<i64: 5, 10>}, {pipeline_mode = #tpu.pipeline_mode<synchronous>, transform_indices = @transform_10, window_bounds = array<i64: 5, 10>}, {pipeline_mode = #tpu.pipeline_mode<synchronous>, transform_indices = @transform_11, window_bounds = array<i64: 5, 80, 120>}, {pipeline_mode = #tpu.pipeline_mode<synchronous>, transform_indices = @transform_12, window_bounds = array<i64: 1, 120>}, {pipeline_mode = #tpu.pipeline_mode<synchronous>, transform_indices = @transform_13, window_bounds = array<i64: 120, 84>}, {pipeline_mode = #tpu.pipeline_mode<synchronous>, transform_indices = @transform_14, window_bounds = array<i64: 1, 84>}, {pipeline_mode = #tpu.pipeline_mode<synchronous>, transform_indices = @transform_15, window_bounds = array<i64: 84, 10>}, {pipeline_mode = #tpu.pipeline_mode<synchronous>, transform_indices = @transform_16, window_bounds = array<i64: 1, 10>}, {transform_indices = @transform_17, window_bounds = array<i64: 8, 10>}]} {
    %c0_i32 = arith.constant 0 : i32
    %c8_i32 = arith.constant 8 : i32
    %0 = arith.addi %c0_i32, %c8_i32 : i32
    %c1_i32 = arith.constant 1 : i32
    scf.for %arg19 = %c0_i32 to %0 step %c1_i32  : i32 {
      %1 = arith.index_cast %arg19 : i32 to index
      %c0 = arith.constant 0 : index
      %c0_1 = arith.constant 0 : index
      %2 = vector.load %arg1[%1, %c0, %c0_1] : memref<8x32x96xf32, #tpu.memory_space<vmem>>, vector<1x32x96xf32>
      %3 = vector.shape_cast %2 : vector<1x32x96xf32> to vector<32x96xf32>
      %cst = arith.constant 0.000000e+00 : f32
      %4 = vector.broadcast %cst : f32 to vector<28x84xf32>
      %cst_2 = arith.constant 0.000000e+00 : f32
      %5 = vector.broadcast %cst_2 : f32 to vector<28x84xf32>
      %6 = vector.extract_strided_slice %3 {offsets = [0, 0], sizes = [28, 96], strides = [1, 1]} : vector<32x96xf32> to vector<28x96xf32>
      %c0_3 = arith.constant 0 : index
      %c0_4 = arith.constant 0 : index
      %c0_5 = arith.constant 0 : index
      %7 = vector.load %arg2[%c0_3, %c0_4, %c0_5] : memref<5x96x84xf32, #tpu.memory_space<vmem>>, vector<1x96x84xf32>
      %8 = vector.shape_cast %7 : vector<1x96x84xf32> to vector<96x84xf32>
      %cst_6 = arith.constant dense<0.000000e+00> : vector<28x84xf32>
      %9 = tpu.matmul %6, %8, %cst_6 {dimension_numbers = #tpu.dot_dimension_numbers<[1], [0], [0], [1], [0, 0, 1, 1], [], []>} : vector<28x96xf32>, vector<96x84xf32>, vector<28x84xf32> -> vector<28x84xf32>
      %10 = arith.addf %4, %9 : vector<28x84xf32>
      %c0_7 = arith.constant 0 : index
      %c0_8 = arith.constant 0 : index
      %c0_9 = arith.constant 0 : index
      %11 = vector.load %arg3[%c0_7, %c0_8, %c0_9] : memref<5x96x84xf32, #tpu.memory_space<vmem>>, vector<1x96x84xf32>
      %12 = vector.shape_cast %11 : vector<1x96x84xf32> to vector<96x84xf32>
      %cst_10 = arith.constant dense<0.000000e+00> : vector<28x84xf32>
      %13 = tpu.matmul %6, %12, %cst_10 {dimension_numbers = #tpu.dot_dimension_numbers<[1], [0], [0], [1], [0, 0, 1, 1], [], []>} : vector<28x96xf32>, vector<96x84xf32>, vector<28x84xf32> -> vector<28x84xf32>
      %14 = arith.addf %5, %13 : vector<28x84xf32>
      %15 = vector.extract_strided_slice %3 {offsets = [1, 0], sizes = [28, 96], strides = [1, 1]} : vector<32x96xf32> to vector<28x96xf32>
      %c1 = arith.constant 1 : index
      %c0_11 = arith.constant 0 : index
      %c0_12 = arith.constant 0 : index
      %16 = vector.load %arg2[%c1, %c0_11, %c0_12] : memref<5x96x84xf32, #tpu.memory_space<vmem>>, vector<1x96x84xf32>
      %17 = vector.shape_cast %16 : vector<1x96x84xf32> to vector<96x84xf32>
      %cst_13 = arith.constant dense<0.000000e+00> : vector<28x84xf32>
      %18 = tpu.matmul %15, %17, %cst_13 {dimension_numbers = #tpu.dot_dimension_numbers<[1], [0], [0], [1], [0, 0, 1, 1], [], []>} : vector<28x96xf32>, vector<96x84xf32>, vector<28x84xf32> -> vector<28x84xf32>
      %19 = arith.addf %10, %18 : vector<28x84xf32>
      %c1_14 = arith.constant 1 : index
      %c0_15 = arith.constant 0 : index
      %c0_16 = arith.constant 0 : index
      %20 = vector.load %arg3[%c1_14, %c0_15, %c0_16] : memref<5x96x84xf32, #tpu.memory_space<vmem>>, vector<1x96x84xf32>
      %21 = vector.shape_cast %20 : vector<1x96x84xf32> to vector<96x84xf32>
      %cst_17 = arith.constant dense<0.000000e+00> : vector<28x84xf32>
      %22 = tpu.matmul %15, %21, %cst_17 {dimension_numbers = #tpu.dot_dimension_numbers<[1], [0], [0], [1], [0, 0, 1, 1], [], []>} : vector<28x96xf32>, vector<96x84xf32>, vector<28x84xf32> -> vector<28x84xf32>
      %23 = arith.addf %14, %22 : vector<28x84xf32>
      %24 = vector.extract_strided_slice %3 {offsets = [2, 0], sizes = [28, 96], strides = [1, 1]} : vector<32x96xf32> to vector<28x96xf32>
      %c2 = arith.constant 2 : index
      %c0_18 = arith.constant 0 : index
      %c0_19 = arith.constant 0 : index
      %25 = vector.load %arg2[%c2, %c0_18, %c0_19] : memref<5x96x84xf32, #tpu.memory_space<vmem>>, vector<1x96x84xf32>
      %26 = vector.shape_cast %25 : vector<1x96x84xf32> to vector<96x84xf32>
      %cst_20 = arith.constant dense<0.000000e+00> : vector<28x84xf32>
      %27 = tpu.matmul %24, %26, %cst_20 {dimension_numbers = #tpu.dot_dimension_numbers<[1], [0], [0], [1], [0, 0, 1, 1], [], []>} : vector<28x96xf32>, vector<96x84xf32>, vector<28x84xf32> -> vector<28x84xf32>
      %28 = arith.addf %19, %27 : vector<28x84xf32>
      %c2_21 = arith.constant 2 : index
      %c0_22 = arith.constant 0 : index
      %c0_23 = arith.constant 0 : index
      %29 = vector.load %arg3[%c2_21, %c0_22, %c0_23] : memref<5x96x84xf32, #tpu.memory_space<vmem>>, vector<1x96x84xf32>
      %30 = vector.shape_cast %29 : vector<1x96x84xf32> to vector<96x84xf32>
      %cst_24 = arith.constant dense<0.000000e+00> : vector<28x84xf32>
      %31 = tpu.matmul %24, %30, %cst_24 {dimension_numbers = #tpu.dot_dimension_numbers<[1], [0], [0], [1], [0, 0, 1, 1], [], []>} : vector<28x96xf32>, vector<96x84xf32>, vector<28x84xf32> -> vector<28x84xf32>
      %32 = arith.addf %23, %31 : vector<28x84xf32>
      %33 = vector.extract_strided_slice %3 {offsets = [3, 0], sizes = [28, 96], strides = [1, 1]} : vector<32x96xf32> to vector<28x96xf32>
      %c3 = arith.constant 3 : index
      %c0_25 = arith.constant 0 : index
      %c0_26 = arith.constant 0 : index
      %34 = vector.load %arg2[%c3, %c0_25, %c0_26] : memref<5x96x84xf32, #tpu.memory_space<vmem>>, vector<1x96x84xf32>
      %35 = vector.shape_cast %34 : vector<1x96x84xf32> to vector<96x84xf32>
      %cst_27 = arith.constant dense<0.000000e+00> : vector<28x84xf32>
      %36 = tpu.matmul %33, %35, %cst_27 {dimension_numbers = #tpu.dot_dimension_numbers<[1], [0], [0], [1], [0, 0, 1, 1], [], []>} : vector<28x96xf32>, vector<96x84xf32>, vector<28x84xf32> -> vector<28x84xf32>
      %37 = arith.addf %28, %36 : vector<28x84xf32>
      %c3_28 = arith.constant 3 : index
      %c0_29 = arith.constant 0 : index
      %c0_30 = arith.constant 0 : index
      %38 = vector.load %arg3[%c3_28, %c0_29, %c0_30] : memref<5x96x84xf32, #tpu.memory_space<vmem>>, vector<1x96x84xf32>
      %39 = vector.shape_cast %38 : vector<1x96x84xf32> to vector<96x84xf32>
      %cst_31 = arith.constant dense<0.000000e+00> : vector<28x84xf32>
      %40 = tpu.matmul %33, %39, %cst_31 {dimension_numbers = #tpu.dot_dimension_numbers<[1], [0], [0], [1], [0, 0, 1, 1], [], []>} : vector<28x96xf32>, vector<96x84xf32>, vector<28x84xf32> -> vector<28x84xf32>
      %41 = arith.addf %32, %40 : vector<28x84xf32>
      %42 = vector.extract_strided_slice %3 {offsets = [4, 0], sizes = [28, 96], strides = [1, 1]} : vector<32x96xf32> to vector<28x96xf32>
      %c4 = arith.constant 4 : index
      %c0_32 = arith.constant 0 : index
      %c0_33 = arith.constant 0 : index
      %43 = vector.load %arg2[%c4, %c0_32, %c0_33] : memref<5x96x84xf32, #tpu.memory_space<vmem>>, vector<1x96x84xf32>
      %44 = vector.shape_cast %43 : vector<1x96x84xf32> to vector<96x84xf32>
      %cst_34 = arith.constant dense<0.000000e+00> : vector<28x84xf32>
      %45 = tpu.matmul %42, %44, %cst_34 {dimension_numbers = #tpu.dot_dimension_numbers<[1], [0], [0], [1], [0, 0, 1, 1], [], []>} : vector<28x96xf32>, vector<96x84xf32>, vector<28x84xf32> -> vector<28x84xf32>
      %46 = arith.addf %37, %45 : vector<28x84xf32>
      %c4_35 = arith.constant 4 : index
      %c0_36 = arith.constant 0 : index
      %c0_37 = arith.constant 0 : index
      %47 = vector.load %arg3[%c4_35, %c0_36, %c0_37] : memref<5x96x84xf32, #tpu.memory_space<vmem>>, vector<1x96x84xf32>
      %48 = vector.shape_cast %47 : vector<1x96x84xf32> to vector<96x84xf32>
      %cst_38 = arith.constant dense<0.000000e+00> : vector<28x84xf32>
      %49 = tpu.matmul %42, %48, %cst_38 {dimension_numbers = #tpu.dot_dimension_numbers<[1], [0], [0], [1], [0, 0, 1, 1], [], []>} : vector<28x96xf32>, vector<96x84xf32>, vector<28x84xf32> -> vector<28x84xf32>
      %50 = arith.addf %41, %49 : vector<28x84xf32>
      %51 = arith.maximumf %46, %50 : vector<28x84xf32>
      %c0_39 = arith.constant 0 : index
      %c0_40 = arith.constant 0 : index
      %52 = vector.load %arg4[%c0_39, %c0_40] : memref<1x84xf32, #tpu.memory_space<vmem>>, vector<1x84xf32>
      %53 = vector.broadcast %52 : vector<1x84xf32> to vector<28x84xf32>
      %54 = arith.addf %51, %53 : vector<28x84xf32>
      %cst_41 = arith.constant 0.000000e+00 : f32
      %55 = vector.broadcast %cst_41 : f32 to vector<28x84xf32>
      %56 = arith.maximumf %54, %55 : vector<28x84xf32>
      %c0_42 = arith.constant 0 : index
      %c0_43 = arith.constant 0 : index
      %57 = vector.load %arg5[%c0_42, %c0_43] : memref<14x28xf32, #tpu.memory_space<vmem>>, vector<14x28xf32>
      %cst_44 = arith.constant dense<0.000000e+00> : vector<14x84xf32>
      %58 = tpu.matmul %57, %56, %cst_44 {dimension_numbers = #tpu.dot_dimension_numbers<[1], [0], [0], [1], [0, 0, 1, 1], [], []>} : vector<14x28xf32>, vector<28x84xf32>, vector<14x84xf32> -> vector<14x84xf32>
      %c0_45 = arith.constant 0 : index
      %c0_46 = arith.constant 0 : index
      %59 = vector.load %arg6[%c0_45, %c0_46] : memref<14x28xf32, #tpu.memory_space<vmem>>, vector<14x28xf32>
      %cst_47 = arith.constant dense<0.000000e+00> : vector<14x84xf32>
      %60 = tpu.matmul %59, %56, %cst_47 {dimension_numbers = #tpu.dot_dimension_numbers<[1], [0], [0], [1], [0, 0, 1, 1], [], []>} : vector<14x28xf32>, vector<28x84xf32>, vector<14x84xf32> -> vector<14x84xf32>
      %61 = arith.maximumf %58, %60 : vector<14x84xf32>
      %cst_48 = arith.constant 0.000000e+00 : f32
      %62 = vector.broadcast %cst_48 : f32 to vector<10x80xf32>
      %cst_49 = arith.constant 0.000000e+00 : f32
      %63 = vector.broadcast %cst_49 : f32 to vector<10x80xf32>
      %64 = vector.extract_strided_slice %61 {offsets = [0, 0], sizes = [10, 84], strides = [1, 1]} : vector<14x84xf32> to vector<10x84xf32>
      %c0_50 = arith.constant 0 : index
      %c0_51 = arith.constant 0 : index
      %c0_52 = arith.constant 0 : index
      %65 = vector.load %arg7[%c0_50, %c0_51, %c0_52] : memref<5x84x80xf32, #tpu.memory_space<vmem>>, vector<1x84x80xf32>
      %66 = vector.shape_cast %65 : vector<1x84x80xf32> to vector<84x80xf32>
      %cst_53 = arith.constant dense<0.000000e+00> : vector<10x80xf32>
      %67 = tpu.matmul %64, %66, %cst_53 {dimension_numbers = #tpu.dot_dimension_numbers<[1], [0], [0], [1], [0, 0, 1, 1], [], []>} : vector<10x84xf32>, vector<84x80xf32>, vector<10x80xf32> -> vector<10x80xf32>
      %68 = arith.addf %62, %67 : vector<10x80xf32>
      %c0_54 = arith.constant 0 : index
      %c0_55 = arith.constant 0 : index
      %c0_56 = arith.constant 0 : index
      %69 = vector.load %arg8[%c0_54, %c0_55, %c0_56] : memref<5x84x80xf32, #tpu.memory_space<vmem>>, vector<1x84x80xf32>
      %70 = vector.shape_cast %69 : vector<1x84x80xf32> to vector<84x80xf32>
      %cst_57 = arith.constant dense<0.000000e+00> : vector<10x80xf32>
      %71 = tpu.matmul %64, %70, %cst_57 {dimension_numbers = #tpu.dot_dimension_numbers<[1], [0], [0], [1], [0, 0, 1, 1], [], []>} : vector<10x84xf32>, vector<84x80xf32>, vector<10x80xf32> -> vector<10x80xf32>
      %72 = arith.addf %63, %71 : vector<10x80xf32>
      %73 = vector.extract_strided_slice %61 {offsets = [1, 0], sizes = [10, 84], strides = [1, 1]} : vector<14x84xf32> to vector<10x84xf32>
      %c1_58 = arith.constant 1 : index
      %c0_59 = arith.constant 0 : index
      %c0_60 = arith.constant 0 : index
      %74 = vector.load %arg7[%c1_58, %c0_59, %c0_60] : memref<5x84x80xf32, #tpu.memory_space<vmem>>, vector<1x84x80xf32>
      %75 = vector.shape_cast %74 : vector<1x84x80xf32> to vector<84x80xf32>
      %cst_61 = arith.constant dense<0.000000e+00> : vector<10x80xf32>
      %76 = tpu.matmul %73, %75, %cst_61 {dimension_numbers = #tpu.dot_dimension_numbers<[1], [0], [0], [1], [0, 0, 1, 1], [], []>} : vector<10x84xf32>, vector<84x80xf32>, vector<10x80xf32> -> vector<10x80xf32>
      %77 = arith.addf %68, %76 : vector<10x80xf32>
      %c1_62 = arith.constant 1 : index
      %c0_63 = arith.constant 0 : index
      %c0_64 = arith.constant 0 : index
      %78 = vector.load %arg8[%c1_62, %c0_63, %c0_64] : memref<5x84x80xf32, #tpu.memory_space<vmem>>, vector<1x84x80xf32>
      %79 = vector.shape_cast %78 : vector<1x84x80xf32> to vector<84x80xf32>
      %cst_65 = arith.constant dense<0.000000e+00> : vector<10x80xf32>
      %80 = tpu.matmul %73, %79, %cst_65 {dimension_numbers = #tpu.dot_dimension_numbers<[1], [0], [0], [1], [0, 0, 1, 1], [], []>} : vector<10x84xf32>, vector<84x80xf32>, vector<10x80xf32> -> vector<10x80xf32>
      %81 = arith.addf %72, %80 : vector<10x80xf32>
      %82 = vector.extract_strided_slice %61 {offsets = [2, 0], sizes = [10, 84], strides = [1, 1]} : vector<14x84xf32> to vector<10x84xf32>
      %c2_66 = arith.constant 2 : index
      %c0_67 = arith.constant 0 : index
      %c0_68 = arith.constant 0 : index
      %83 = vector.load %arg7[%c2_66, %c0_67, %c0_68] : memref<5x84x80xf32, #tpu.memory_space<vmem>>, vector<1x84x80xf32>
      %84 = vector.shape_cast %83 : vector<1x84x80xf32> to vector<84x80xf32>
      %cst_69 = arith.constant dense<0.000000e+00> : vector<10x80xf32>
      %85 = tpu.matmul %82, %84, %cst_69 {dimension_numbers = #tpu.dot_dimension_numbers<[1], [0], [0], [1], [0, 0, 1, 1], [], []>} : vector<10x84xf32>, vector<84x80xf32>, vector<10x80xf32> -> vector<10x80xf32>
      %86 = arith.addf %77, %85 : vector<10x80xf32>
      %c2_70 = arith.constant 2 : index
      %c0_71 = arith.constant 0 : index
      %c0_72 = arith.constant 0 : index
      %87 = vector.load %arg8[%c2_70, %c0_71, %c0_72] : memref<5x84x80xf32, #tpu.memory_space<vmem>>, vector<1x84x80xf32>
      %88 = vector.shape_cast %87 : vector<1x84x80xf32> to vector<84x80xf32>
      %cst_73 = arith.constant dense<0.000000e+00> : vector<10x80xf32>
      %89 = tpu.matmul %82, %88, %cst_73 {dimension_numbers = #tpu.dot_dimension_numbers<[1], [0], [0], [1], [0, 0, 1, 1], [], []>} : vector<10x84xf32>, vector<84x80xf32>, vector<10x80xf32> -> vector<10x80xf32>
      %90 = arith.addf %81, %89 : vector<10x80xf32>
      %91 = vector.extract_strided_slice %61 {offsets = [3, 0], sizes = [10, 84], strides = [1, 1]} : vector<14x84xf32> to vector<10x84xf32>
      %c3_74 = arith.constant 3 : index
      %c0_75 = arith.constant 0 : index
      %c0_76 = arith.constant 0 : index
      %92 = vector.load %arg7[%c3_74, %c0_75, %c0_76] : memref<5x84x80xf32, #tpu.memory_space<vmem>>, vector<1x84x80xf32>
      %93 = vector.shape_cast %92 : vector<1x84x80xf32> to vector<84x80xf32>
      %cst_77 = arith.constant dense<0.000000e+00> : vector<10x80xf32>
      %94 = tpu.matmul %91, %93, %cst_77 {dimension_numbers = #tpu.dot_dimension_numbers<[1], [0], [0], [1], [0, 0, 1, 1], [], []>} : vector<10x84xf32>, vector<84x80xf32>, vector<10x80xf32> -> vector<10x80xf32>
      %95 = arith.addf %86, %94 : vector<10x80xf32>
      %c3_78 = arith.constant 3 : index
      %c0_79 = arith.constant 0 : index
      %c0_80 = arith.constant 0 : index
      %96 = vector.load %arg8[%c3_78, %c0_79, %c0_80] : memref<5x84x80xf32, #tpu.memory_space<vmem>>, vector<1x84x80xf32>
      %97 = vector.shape_cast %96 : vector<1x84x80xf32> to vector<84x80xf32>
      %cst_81 = arith.constant dense<0.000000e+00> : vector<10x80xf32>
      %98 = tpu.matmul %91, %97, %cst_81 {dimension_numbers = #tpu.dot_dimension_numbers<[1], [0], [0], [1], [0, 0, 1, 1], [], []>} : vector<10x84xf32>, vector<84x80xf32>, vector<10x80xf32> -> vector<10x80xf32>
      %99 = arith.addf %90, %98 : vector<10x80xf32>
      %100 = vector.extract_strided_slice %61 {offsets = [4, 0], sizes = [10, 84], strides = [1, 1]} : vector<14x84xf32> to vector<10x84xf32>
      %c4_82 = arith.constant 4 : index
      %c0_83 = arith.constant 0 : index
      %c0_84 = arith.constant 0 : index
      %101 = vector.load %arg7[%c4_82, %c0_83, %c0_84] : memref<5x84x80xf32, #tpu.memory_space<vmem>>, vector<1x84x80xf32>
      %102 = vector.shape_cast %101 : vector<1x84x80xf32> to vector<84x80xf32>
      %cst_85 = arith.constant dense<0.000000e+00> : vector<10x80xf32>
      %103 = tpu.matmul %100, %102, %cst_85 {dimension_numbers = #tpu.dot_dimension_numbers<[1], [0], [0], [1], [0, 0, 1, 1], [], []>} : vector<10x84xf32>, vector<84x80xf32>, vector<10x80xf32> -> vector<10x80xf32>
      %104 = arith.addf %95, %103 : vector<10x80xf32>
      %c4_86 = arith.constant 4 : index
      %c0_87 = arith.constant 0 : index
      %c0_88 = arith.constant 0 : index
      %105 = vector.load %arg8[%c4_86, %c0_87, %c0_88] : memref<5x84x80xf32, #tpu.memory_space<vmem>>, vector<1x84x80xf32>
      %106 = vector.shape_cast %105 : vector<1x84x80xf32> to vector<84x80xf32>
      %cst_89 = arith.constant dense<0.000000e+00> : vector<10x80xf32>
      %107 = tpu.matmul %100, %106, %cst_89 {dimension_numbers = #tpu.dot_dimension_numbers<[1], [0], [0], [1], [0, 0, 1, 1], [], []>} : vector<10x84xf32>, vector<84x80xf32>, vector<10x80xf32> -> vector<10x80xf32>
      %108 = arith.addf %99, %107 : vector<10x80xf32>
      %109 = arith.maximumf %104, %108 : vector<10x80xf32>
      %c0_90 = arith.constant 0 : index
      %c0_91 = arith.constant 0 : index
      %110 = vector.load %arg9[%c0_90, %c0_91] : memref<1x80xf32, #tpu.memory_space<vmem>>, vector<1x80xf32>
      %111 = vector.broadcast %110 : vector<1x80xf32> to vector<10x80xf32>
      %112 = arith.addf %109, %111 : vector<10x80xf32>
      %cst_92 = arith.constant 0.000000e+00 : f32
      %113 = vector.broadcast %cst_92 : f32 to vector<10x80xf32>
      %114 = arith.maximumf %112, %113 : vector<10x80xf32>
      %c0_93 = arith.constant 0 : index
      %c0_94 = arith.constant 0 : index
      %115 = vector.load %arg10[%c0_93, %c0_94] : memref<5x10xf32, #tpu.memory_space<vmem>>, vector<5x10xf32>
      %cst_95 = arith.constant dense<0.000000e+00> : vector<5x80xf32>
      %116 = tpu.matmul %115, %114, %cst_95 {dimension_numbers = #tpu.dot_dimension_numbers<[1], [0], [0], [1], [0, 0, 1, 1], [], []>} : vector<5x10xf32>, vector<10x80xf32>, vector<5x80xf32> -> vector<5x80xf32>
      %c0_96 = arith.constant 0 : index
      %c0_97 = arith.constant 0 : index
      %117 = vector.load %arg11[%c0_96, %c0_97] : memref<5x10xf32, #tpu.memory_space<vmem>>, vector<5x10xf32>
      %cst_98 = arith.constant dense<0.000000e+00> : vector<5x80xf32>
      %118 = tpu.matmul %117, %114, %cst_98 {dimension_numbers = #tpu.dot_dimension_numbers<[1], [0], [0], [1], [0, 0, 1, 1], [], []>} : vector<5x10xf32>, vector<10x80xf32>, vector<5x80xf32> -> vector<5x80xf32>
      %119 = arith.maximumf %116, %118 : vector<5x80xf32>
      %c0_99 = arith.constant 0 : index
      %c0_100 = arith.constant 0 : index
      %120 = vector.load %arg13[%c0_99, %c0_100] : memref<1x120xf32, #tpu.memory_space<vmem>>, vector<1x120xf32>
      %121 = vector.extract_strided_slice %119 {offsets = [0, 0], sizes = [1, 80], strides = [1, 1]} : vector<5x80xf32> to vector<1x80xf32>
      %c0_101 = arith.constant 0 : index
      %c0_102 = arith.constant 0 : index
      %c0_103 = arith.constant 0 : index
      %122 = vector.load %arg12[%c0_101, %c0_102, %c0_103] : memref<5x80x120xf32, #tpu.memory_space<vmem>>, vector<1x80x120xf32>
      %123 = vector.shape_cast %122 : vector<1x80x120xf32> to vector<80x120xf32>
      %cst_104 = arith.constant dense<0.000000e+00> : vector<1x120xf32>
      %124 = tpu.matmul %121, %123, %cst_104 {dimension_numbers = #tpu.dot_dimension_numbers<[1], [0], [0], [1], [0, 0, 1, 1], [], []>} : vector<1x80xf32>, vector<80x120xf32>, vector<1x120xf32> -> vector<1x120xf32>
      %125 = arith.addf %120, %124 : vector<1x120xf32>
      %126 = vector.extract_strided_slice %119 {offsets = [1, 0], sizes = [1, 80], strides = [1, 1]} : vector<5x80xf32> to vector<1x80xf32>
      %c1_105 = arith.constant 1 : index
      %c0_106 = arith.constant 0 : index
      %c0_107 = arith.constant 0 : index
      %127 = vector.load %arg12[%c1_105, %c0_106, %c0_107] : memref<5x80x120xf32, #tpu.memory_space<vmem>>, vector<1x80x120xf32>
      %128 = vector.shape_cast %127 : vector<1x80x120xf32> to vector<80x120xf32>
      %cst_108 = arith.constant dense<0.000000e+00> : vector<1x120xf32>
      %129 = tpu.matmul %126, %128, %cst_108 {dimension_numbers = #tpu.dot_dimension_numbers<[1], [0], [0], [1], [0, 0, 1, 1], [], []>} : vector<1x80xf32>, vector<80x120xf32>, vector<1x120xf32> -> vector<1x120xf32>
      %130 = arith.addf %125, %129 : vector<1x120xf32>
      %131 = vector.extract_strided_slice %119 {offsets = [2, 0], sizes = [1, 80], strides = [1, 1]} : vector<5x80xf32> to vector<1x80xf32>
      %c2_109 = arith.constant 2 : index
      %c0_110 = arith.constant 0 : index
      %c0_111 = arith.constant 0 : index
      %132 = vector.load %arg12[%c2_109, %c0_110, %c0_111] : memref<5x80x120xf32, #tpu.memory_space<vmem>>, vector<1x80x120xf32>
      %133 = vector.shape_cast %132 : vector<1x80x120xf32> to vector<80x120xf32>
      %cst_112 = arith.constant dense<0.000000e+00> : vector<1x120xf32>
      %134 = tpu.matmul %131, %133, %cst_112 {dimension_numbers = #tpu.dot_dimension_numbers<[1], [0], [0], [1], [0, 0, 1, 1], [], []>} : vector<1x80xf32>, vector<80x120xf32>, vector<1x120xf32> -> vector<1x120xf32>
      %135 = arith.addf %130, %134 : vector<1x120xf32>
      %136 = vector.extract_strided_slice %119 {offsets = [3, 0], sizes = [1, 80], strides = [1, 1]} : vector<5x80xf32> to vector<1x80xf32>
      %c3_113 = arith.constant 3 : index
      %c0_114 = arith.constant 0 : index
      %c0_115 = arith.constant 0 : index
      %137 = vector.load %arg12[%c3_113, %c0_114, %c0_115] : memref<5x80x120xf32, #tpu.memory_space<vmem>>, vector<1x80x120xf32>
      %138 = vector.shape_cast %137 : vector<1x80x120xf32> to vector<80x120xf32>
      %cst_116 = arith.constant dense<0.000000e+00> : vector<1x120xf32>
      %139 = tpu.matmul %136, %138, %cst_116 {dimension_numbers = #tpu.dot_dimension_numbers<[1], [0], [0], [1], [0, 0, 1, 1], [], []>} : vector<1x80xf32>, vector<80x120xf32>, vector<1x120xf32> -> vector<1x120xf32>
      %140 = arith.addf %135, %139 : vector<1x120xf32>
      %141 = vector.extract_strided_slice %119 {offsets = [4, 0], sizes = [1, 80], strides = [1, 1]} : vector<5x80xf32> to vector<1x80xf32>
      %c4_117 = arith.constant 4 : index
      %c0_118 = arith.constant 0 : index
      %c0_119 = arith.constant 0 : index
      %142 = vector.load %arg12[%c4_117, %c0_118, %c0_119] : memref<5x80x120xf32, #tpu.memory_space<vmem>>, vector<1x80x120xf32>
      %143 = vector.shape_cast %142 : vector<1x80x120xf32> to vector<80x120xf32>
      %cst_120 = arith.constant dense<0.000000e+00> : vector<1x120xf32>
      %144 = tpu.matmul %141, %143, %cst_120 {dimension_numbers = #tpu.dot_dimension_numbers<[1], [0], [0], [1], [0, 0, 1, 1], [], []>} : vector<1x80xf32>, vector<80x120xf32>, vector<1x120xf32> -> vector<1x120xf32>
      %145 = arith.addf %140, %144 : vector<1x120xf32>
      %cst_121 = arith.constant 0.000000e+00 : f32
      %146 = vector.broadcast %cst_121 : f32 to vector<1x120xf32>
      %147 = arith.maximumf %145, %146 : vector<1x120xf32>
      %c0_122 = arith.constant 0 : index
      %c0_123 = arith.constant 0 : index
      %148 = vector.load %arg14[%c0_122, %c0_123] : memref<120x84xf32, #tpu.memory_space<vmem>>, vector<120x84xf32>
      %cst_124 = arith.constant dense<0.000000e+00> : vector<1x84xf32>
      %149 = tpu.matmul %147, %148, %cst_124 {dimension_numbers = #tpu.dot_dimension_numbers<[1], [0], [0], [1], [0, 0, 1, 1], [], []>} : vector<1x120xf32>, vector<120x84xf32>, vector<1x84xf32> -> vector<1x84xf32>
      %c0_125 = arith.constant 0 : index
      %c0_126 = arith.constant 0 : index
      %150 = vector.load %arg15[%c0_125, %c0_126] : memref<1x84xf32, #tpu.memory_space<vmem>>, vector<1x84xf32>
      %151 = arith.addf %149, %150 : vector<1x84xf32>
      %cst_127 = arith.constant 0.000000e+00 : f32
      %152 = vector.broadcast %cst_127 : f32 to vector<1x84xf32>
      %153 = arith.maximumf %151, %152 : vector<1x84xf32>
      %c0_128 = arith.constant 0 : index
      %c0_129 = arith.constant 0 : index
      %154 = vector.load %arg16[%c0_128, %c0_129] : memref<84x10xf32, #tpu.memory_space<vmem>>, vector<84x10xf32>
      %cst_130 = arith.constant dense<0.000000e+00> : vector<1x10xf32>
      %155 = tpu.matmul %153, %154, %cst_130 {dimension_numbers = #tpu.dot_dimension_numbers<[1], [0], [0], [1], [0, 0, 1, 1], [], []>} : vector<1x84xf32>, vector<84x10xf32>, vector<1x10xf32> -> vector<1x10xf32>
      %c0_131 = arith.constant 0 : index
      %c0_132 = arith.constant 0 : index
      %156 = vector.load %arg17[%c0_131, %c0_132] : memref<1x10xf32, #tpu.memory_space<vmem>>, vector<1x10xf32>
      %157 = arith.addf %155, %156 : vector<1x10xf32>
      %158 = arith.index_cast %arg19 : i32 to index
      %c0_133 = arith.constant 0 : index
      %159 = vector.load %arg18[%158, %c0_133] : memref<8x10xf32, #tpu.memory_space<vmem>>, vector<1x10xf32>
      tpu.vector_store %arg18[%158, %c0_133], %157 {strides = array<i32>} : memref<8x10xf32, #tpu.memory_space<vmem>>, vector<1x10xf32>,
    }
    %c8_i32_0 = arith.constant 8 : i32
    return
  }
  func.func @transform_0(%arg0: i32) -> (i32, i32, i32) {
    %c0_i32 = arith.constant 0 : i32
    %c0_i32_0 = arith.constant 0 : i32
    %c0_i32_1 = arith.constant 0 : i32
    return %arg0, %c0_i32, %c0_i32_0 : i32, i32, i32
  }
  func.func @transform_1(%arg0: i32) -> (i32, i32, i32) {
    %c0_i32 = arith.constant 0 : i32
    %c0_i32_0 = arith.constant 0 : i32
    %c0_i32_1 = arith.constant 0 : i32
    %c0_i32_2 = arith.constant 0 : i32
    return %c0_i32, %c0_i32_0, %c0_i32_1 : i32, i32, i32
  }
  func.func @transform_2(%arg0: i32) -> (i32, i32, i32) {
    %c0_i32 = arith.constant 0 : i32
    %c0_i32_0 = arith.constant 0 : i32
    %c0_i32_1 = arith.constant 0 : i32
    %c0_i32_2 = arith.constant 0 : i32
    return %c0_i32, %c0_i32_0, %c0_i32_1 : i32, i32, i32
  }
  func.func @transform_3(%arg0: i32) -> (i32, i32) {
    %c0_i32 = arith.constant 0 : i32
    %c0_i32_0 = arith.constant 0 : i32
    %c0_i32_1 = arith.constant 0 : i32
    return %c0_i32, %c0_i32_0 : i32, i32
  }
  func.func @transform_4(%arg0: i32) -> (i32, i32) {
    %c0_i32 = arith.constant 0 : i32
    %c0_i32_0 = arith.constant 0 : i32
    %c0_i32_1 = arith.constant 0 : i32
    return %c0_i32, %c0_i32_0 : i32, i32
  }
  func.func @transform_5(%arg0: i32) -> (i32, i32) {
    %c0_i32 = arith.constant 0 : i32
    %c0_i32_0 = arith.constant 0 : i32
    %c0_i32_1 = arith.constant 0 : i32
    return %c0_i32, %c0_i32_0 : i32, i32
  }
  func.func @transform_6(%arg0: i32) -> (i32, i32, i32) {
    %c0_i32 = arith.constant 0 : i32
    %c0_i32_0 = arith.constant 0 : i32
    %c0_i32_1 = arith.constant 0 : i32
    %c0_i32_2 = arith.constant 0 : i32
    return %c0_i32, %c0_i32_0, %c0_i32_1 : i32, i32, i32
  }
  func.func @transform_7(%arg0: i32) -> (i32, i32, i32) {
    %c0_i32 = arith.constant 0 : i32
    %c0_i32_0 = arith.constant 0 : i32
    %c0_i32_1 = arith.constant 0 : i32
    %c0_i32_2 = arith.constant 0 : i32
    return %c0_i32, %c0_i32_0, %c0_i32_1 : i32, i32, i32
  }
  func.func @transform_8(%arg0: i32) -> (i32, i32) {
    %c0_i32 = arith.constant 0 : i32
    %c0_i32_0 = arith.constant 0 : i32
    %c0_i32_1 = arith.constant 0 : i32
    return %c0_i32, %c0_i32_0 : i32, i32
  }
  func.func @transform_9(%arg0: i32) -> (i32, i32) {
    %c0_i32 = arith.constant 0 : i32
    %c0_i32_0 = arith.constant 0 : i32
    %c0_i32_1 = arith.constant 0 : i32
    return %c0_i32, %c0_i32_0 : i32, i32
  }
  func.func @transform_10(%arg0: i32) -> (i32, i32) {
    %c0_i32 = arith.constant 0 : i32
    %c0_i32_0 = arith.constant 0 : i32
    %c0_i32_1 = arith.constant 0 : i32
    return %c0_i32, %c0_i32_0 : i32, i32
  }
  func.func @transform_11(%arg0: i32) -> (i32, i32, i32) {
    %c0_i32 = arith.constant 0 : i32
    %c0_i32_0 = arith.constant 0 : i32
    %c0_i32_1 = arith.constant 0 : i32
    %c0_i32_2 = arith.constant 0 : i32
    return %c0_i32, %c0_i32_0, %c0_i32_1 : i32, i32, i32
  }
  func.func @transform_12(%arg0: i32) -> (i32, i32) {
    %c0_i32 = arith.constant 0 : i32
    %c0_i32_0 = arith.constant 0 : i32
    %c0_i32_1 = arith.constant 0 : i32
    return %c0_i32, %c0_i32_0 : i32, i32
  }
  func.func @transform_13(%arg0: i32) -> (i32, i32) {
    %c0_i32 = arith.constant 0 : i32
    %c0_i32_0 = arith.constant 0 : i32
    %c0_i32_1 = arith.constant 0 : i32
    return %c0_i32, %c0_i32_0 : i32, i32
  }
  func.func @transform_14(%arg0: i32) -> (i32, i32) {
    %c0_i32 = arith.constant 0 : i32
    %c0_i32_0 = arith.constant 0 : i32
    %c0_i32_1 = arith.constant 0 : i32
    return %c0_i32, %c0_i32_0 : i32, i32
  }
  func.func @transform_15(%arg0: i32) -> (i32, i32) {
    %c0_i32 = arith.constant 0 : i32
    %c0_i32_0 = arith.constant 0 : i32
    %c0_i32_1 = arith.constant 0 : i32
    return %c0_i32, %c0_i32_0 : i32, i32
  }
  func.func @transform_16(%arg0: i32) -> (i32, i32) {
    %c0_i32 = arith.constant 0 : i32
    %c0_i32_0 = arith.constant 0 : i32
    %c0_i32_1 = arith.constant 0 : i32
    return %c0_i32, %c0_i32_0 : i32, i32
  }
  func.func @transform_17(%arg0: i32) -> (i32, i32) {
    %c0_i32 = arith.constant 0 : i32
    %c0_i32_0 = arith.constant 0 : i32
    return %arg0, %c0_i32 : i32, i32
  }
}

</mosaic_0001>

<bundles_post_ra>
// kernel: tile.13
= control target key start
LH: loop header
LB: loop body
LE: loop exit
PB: predicated region body
PF: predicated region fallthrough
CT: control target
= control target key end

     0   :  { %s28_s0 = inlined_call_operand.vmem [shape: f32[6], index: 0, kind: input, shape index: {}]   ;;  %s29_s1 = inlined_call_operand.vmem [shape: f32[14,6], index: 1, kind: output, shape index: {}]  }
   0x1   :  { %v4_v0 = vld [vmem:[%s28_s0] ss:$0 sm:$0xff] }
   0x2   :  { %5 = vst [vmem:[%s29_s1] sm:$0xff] %v4_v0 }
   0x3   :  { %8 = vst [vmem:[%s29_s1 + $0x8] sm:$0xff] %v4_v0 }

// kernel: tile.14
= control target key start
LH: loop header
LB: loop body
LE: loop exit
PB: predicated region body
PF: predicated region fallthrough
CT: control target
= control target key end

     0   :  { %s115_s10 = smov 78   ;;  %s116_s11 = smov 66   ;;  %vm3_vm0 = vcmask 48128   ;;  %vm9_vm1 = vcmask 687728   ;;  %vm15_vm2 = vcmask 638528   ;;  %vm21_vm3 = vcmask 589328   ;;  %s183_s0 = inlined_call_operand.vmem [shape: f32[14,6], index: 0, kind: input, shape index: {}]   ;;  %s184_s1 = inlined_call_operand.vmem [shape: f32[1,84], index: 1, kind: output, shape index: {}]  }
   0x1   :  { %v89_v0 = vld [vmem:[%s183_s0 + $0xd] sm:$0x1]   ;;  %v91_v1 = vld [vmem:[%s183_s0 + $0xb] sm:$0x1]   ;;  %v93_v2 = vld [vmem:[%s183_s0 + $0x9] sm:$0x1]  }
   0x2   :  { %7 = vrot.lane.b32.xlu0 %v89_v0, %s115_s10  ;;  %19 = vrot.lane.b32.xlu1 %v91_v1, %s116_s11  ;;  %s117_s14 = smov 54   ;;  %v90_v3 = vld [vmem:[%s183_s0 + $0xc] sm:$0x1]   ;;  %v92_v4 = vld [vmem:[%s183_s0 + $0xa] sm:$0x1]   ;;  %s118_s19 = smov 72  }
   0x3   :  { %31 = vrot.lane.b32.xlu2 %v93_v2, %s117_s14  ;;  %s119_s20 = smov 60   ;;  %v94_v5 = vld [vmem:[%s183_s0 + $0x8] sm:$0x1]   ;;  %s120_s23 = smov 48   ;;  %v95_v6 = vld [vmem:[%s183_s0 + $0x7] sm:$0x1]  }
   0x4   :  { %v96_v7 = vld [vmem:[%s183_s0 + $0x6] sm:$0x1]   ;;  %s121_s28 = smov 42   ;;  %s122_s29 = smov 36   ;;  %v97_v8 = vld [vmem:[%s183_s0 + $0x5] sm:$0x1]  }
   0x5   :  { %s123_s3 = smov 30   ;;  %v98_v9 = vld [vmem:[%s183_s0 + $0x4] sm:$0x1]   ;;  %v99_v10 = vld [vmem:[%s183_s0 + $0x3] sm:$0x1]   ;;  %s124_s8 = smov 24  }
   0x6   :  { %s125_s9 = smov 18   ;;  %v100_v11 = vld [vmem:[%s183_s0 + $0x2] sm:$0x1]   ;;  %s126_s12 = smov 12   ;;  %v101_v12 = vld [vmem:[%s183_s0 + $0x1] sm:$0x1]  }
   0x7   :  { %s127_s15 = smov 6   ;;  %v2_v13 = vld [vmem:[%s183_s0] sm:$0x1]   ;;  %vm27_vm4 = vcmask 540128   ;;  %vm33_vm5 = vcmask 490928   ;;  %vm39_vm6 = vcmask 441728  }
   0x8   :  { %4 = vst.msk [vmem:[#allocation0] sm:$0x1] %vm3_vm0, %v2_v13   ;;  %vm45_vm7 = vcmask 392528   ;;  %vm51_vm8 = vcmask 343328   ;;  %vm57_vm9 = vcmask 294128   ;;  %vm63_vm10 = vcmask 244928  }
   0x9   :  { %vm69_vm11 = vcmask 195728   ;;  %vm75_vm12 = vcmask 146528   ;;  %vm81_vm13 = vcmask 97328  }
   0xa   :  { %13 = vrot.lane.b32.xlu0 %v90_v3, %s118_s19  ;;  %25 = vrot.lane.b32.xlu1 %v92_v4, %s119_s20 }
   0xb   :  { %37 = vrot.lane.b32.xlu2 %v94_v5, %s120_s23 }
  0x12   :  { %43 = vrot.lane.b32.xlu0 %v95_v6, %s121_s28  ;;  %49 = vrot.lane.b32.xlu1 %v96_v7, %s122_s29 }
  0x13   :  { %55 = vrot.lane.b32.xlu2 %v97_v8, %s123_s3 }
  0x1a   :  { %61 = vrot.lane.b32.xlu0 %v98_v9, %s124_s8  ;;  %67 = vrot.lane.b32.xlu1 %v99_v10, %s125_s9 }
  0x1b   :  { %73 = vrot.lane.b32.xlu2 %v100_v11, %s126_s12 }
  0x22   :  { %79 = vrot.lane.b32.xlu0 %v101_v12, %s127_s15 }
  0x5d   :  { %v32_v14 = vpop.permute.xlu2 %31  }
  0x65   :  { %v38_v15 = vpop.permute.xlu2 %37  }
  0x6d   :  { %v56_v16 = vpop.permute.xlu2 %55  }
  0x74   :  { %v8_v17 = vpop.permute.xlu0 %7   ;;  %v20_v18 = vpop.permute.xlu1 %19  }
  0x75   :  { %10 = vst.msk [vmem:[#allocation0] sm:$0x1] %vm9_vm1, %v8_v17   ;;  %v74_v19 = vpop.permute.xlu2 %73  }
  0x7c   :  { %v14_v20 = vpop.permute.xlu0 %13   ;;  %v26_v21 = vpop.permute.xlu1 %25  }
  0x7d   :  { %16 = vst.msk [vmem:[#allocation0] sm:$0x1] %vm15_vm2, %v14_v20  }
  0x7e   :  { %22 = vst.msk [vmem:[#allocation0] sm:$0x1] %vm21_vm3, %v20_v18  }
  0x7f   :  { %28 = vst.msk [vmem:[#allocation0] sm:$0x1] %vm27_vm4, %v26_v21  }
  0x80   :  { %34 = vst.msk [vmem:[#allocation0] sm:$0x1] %vm33_vm5, %v32_v14  }
  0x81   :  { %40 = vst.msk [vmem:[#allocation0] sm:$0x1] %vm39_vm6, %v38_v15  }
  0x84   :  { %v44_v22 = vpop.permute.xlu0 %43   ;;  %v50_v23 = vpop.permute.xlu1 %49  }
  0x85   :  { %46 = vst.msk [vmem:[#allocation0] sm:$0x1] %vm45_vm7, %v44_v22  }
  0x86   :  { %52 = vst.msk [vmem:[#allocation0] sm:$0x1] %vm51_vm8, %v50_v23  }
  0x87   :  { %58 = vst.msk [vmem:[#allocation0] sm:$0x1] %vm57_vm9, %v56_v16  }
  0x8c   :  { %v62_v24 = vpop.permute.xlu0 %61   ;;  %v68_v25 = vpop.permute.xlu1 %67  }
  0x8d   :  { %64 = vst.msk [vmem:[#allocation0] sm:$0x1] %vm63_vm10, %v62_v24  }
  0x8e   :  { %70 = vst.msk [vmem:[#allocation0] sm:$0x1] %vm69_vm11, %v68_v25  }
  0x8f   :  { %76 = vst.msk [vmem:[#allocation0] sm:$0x1] %vm75_vm12, %v74_v19  }
  0x94   :  { %v80_v26 = vpop.permute.xlu0 %79  }
  0x95   :  { %82 = vst.msk [vmem:[#allocation0] sm:$0x1] %vm81_vm13, %v80_v26  }
  0x9c   :  { %v85_v27 = vld [vmem:[#allocation0] sm:$0x1] }
  0x9d   :  { %88 = vst [vmem:[%s184_s1] sm:$0x1] %v85_v27 }

// kernel: tile.18
= control target key start
LH: loop header
LB: loop body
LE: loop exit
PB: predicated region body
PF: predicated region fallthrough
CT: control target
= control target key end

     0   :  { %s22_s0 = inlined_call_operand.vmem [shape: f32[16], index: 0, kind: input, shape index: {}]   ;;  %s23_s1 = inlined_call_operand.vmem [shape: f32[5,16], index: 1, kind: output, shape index: {}]  }
   0x1   :  { %v4_v0 = vld [vmem:[%s22_s0] ss:$0 sm:$0xff] }
   0x2   :  { %5 = vst [vmem:[%s23_s1] sm:$0xff] %v4_v0 }

// kernel: tile.19
= control target key start
LH: loop header
LB: loop body
LE: loop exit
PB: predicated region body
PF: predicated region fallthrough
CT: control target
= control target key end

     0   :  { %s43_s10 = smov 64   ;;  %s44_s11 = smov 32   ;;  %vm3_vm0 = vcmask 130048   ;;  %vm9_vm1 = vcmask 654848   ;;  %vm15_vm2 = vcmask 523648   ;;  %vm21_vm3 = vcmask 392448   ;;  %s75_s0 = inlined_call_operand.vmem [shape: f32[5,16], index: 0, kind: input, shape index: {}]   ;;  %s76_s1 = inlined_call_operand.vmem [shape: f32[1,80], index: 1, kind: output, shape index: {}]  }
   0x1   :  { %v35_v0 = vld [vmem:[%s75_s0 + $0x4] sm:$0x1]   ;;  %v37_v1 = vld [vmem:[%s75_s0 + $0x2] sm:$0x1]   ;;  %v36_v2 = vld [vmem:[%s75_s0 + $0x3] sm:$0x1]  }
   0x2   :  { %7 = vrot.lane.b32.xlu0 %v35_v0, %s43_s10  ;;  %19 = vrot.lane.b32.xlu1 %v37_v1, %s44_s11  ;;  %v38_v3 = vld [vmem:[%s75_s0 + $0x1] sm:$0x1]   ;;  %s45_s16 = smov 48   ;;  %s46_s17 = smov 16   ;;  %v2_v4 = vld [vmem:[%s75_s0] sm:$0x1]  }
   0x3   :  { %4 = vst.msk [vmem:[#allocation0] sm:$0x1] %vm3_vm0, %v2_v4   ;;  %vm27_vm4 = vcmask 261248  }
   0xa   :  { %13 = vrot.lane.b32.xlu0 %v36_v2, %s45_s16  ;;  %25 = vrot.lane.b32.xlu1 %v38_v3, %s46_s17 }
  0x74   :  { %v8_v5 = vpop.permute.xlu0 %7   ;;  %v20_v6 = vpop.permute.xlu1 %19  }
  0x75   :  { %10 = vst.msk [vmem:[#allocation0] sm:$0x1] %vm9_vm1, %v8_v5  }
  0x7c   :  { %v14_v7 = vpop.permute.xlu0 %13   ;;  %v26_v8 = vpop.permute.xlu1 %25  }
  0x7d   :  { %16 = vst.msk [vmem:[#allocation0] sm:$0x1] %vm15_vm2, %v14_v7  }
  0x7e   :  { %22 = vst.msk [vmem:[#allocation0] sm:$0x1] %vm21_vm3, %v20_v6  }
  0x7f   :  { %28 = vst.msk [vmem:[#allocation0] sm:$0x1] %vm27_vm4, %v26_v8  }
  0x86   :  { %v31_v9 = vld [vmem:[#allocation0] sm:$0x1] }
  0x87   :  { %34 = vst [vmem:[%s76_s1] sm:$0x1] %v31_v9 }

// kernel: forward.1
= control target key start
LH: loop header
LB: loop body
LE: loop exit
PB: predicated region body
PF: predicated region fallthrough
CT: control target
= control target key end

     0   :  { %s1864_s24 = smov 0   ;;  %s2992_s0 = inlined_call_operand.vmem [shape: f32[8,32,96], index: 0, kind: input, shape index: {}]   ;;  %s2993_s1 = inlined_call_operand.vmem [shape: f32[5,96,84], index: 1, kind: input, shape index: {}]   ;;  %s2994_s2 = inlined_call_operand.vmem [shape: f32[5,96,84], index: 2, kind: input, shape index: {}]   ;;  %s2995_s3 = inlined_call_operand.vmem [shape: f32[1,84], index: 3, kind: input, shape index: {}]   ;;  %s2996_s4 = inlined_call_operand.vmem [shape: f32[14,28], index: 4, kind: input, shape index: {}]   ;;  %s2997_s5 = inlined_call_operand.vmem [shape: f32[14,28], index: 5, kind: input, shape index: {}]   ;;  %s2998_s6 = inlined_call_operand.vmem [shape: f32[5,84,80], index: 6, kind: input, shape index: {}]   ;;  %s2999_s7 = inlined_call_operand.vmem [shape: f32[5,84,80], index: 7, kind: input, shape index: {}]   ;;  %s3000_s8 = inlined_call_operand.vmem [shape: f32[1,80], index: 8, kind: input, shape index: {}]   ;;  %s3001_s9 = inlined_call_operand.vmem [shape: f32[5,10], index: 9, kind: input, shape index: {}]   ;;  %s3002_s10 = inlined_call_operand.vmem [shape: f32[5,10], index: 10, kind: input, shape index: {}]   ;;  %s3003_s11 = inlined_call_operand.vmem [shape: f32[5,80,120], index: 11, kind: input, shape index: {}]   ;;  %s3004_s12 = inlined_call_operand.vmem [shape: f32[1,120], index: 12, kind: input, shape index: {}]   ;;  %s3005_s13 = inlined_call_operand.vmem [shape: f32[120,84], index: 13, kind: input, shape index: {}]   ;;  %s3006_s14 = inlined_call_operand.vmem [shape: f32[1,84], index: 14, kind: input, shape index: {}]   ;;  %s3007_s15 = inlined_call_operand.vmem [shape: f32[84,10], index: 15, kind: input, shape index: {}]   ;;  %s3008_s16 = inlined_call_operand.vmem [shape: f32[1,10], index: 16, kind: input, shape index: {}]   ;;  %s3009_s17 = inlined_call_operand.vmem [shape: f32[8,10], index: 17, kind: output, shape index: {}]  }
   0x1   :  { %3011 = sst [smem:[#allocation2_spill]] %s2992_s0 }
   0x2   :  { %3012 = sst [smem:[#allocation3_spill]] %s2993_s1 }
   0x3 LB: > { %s3013_s27 = sld [smem:[#allocation3_spill]]  ;;  %v1463_v2 = vld [vmem:[%s2994_s2 + $0xb8] sm:$0xff]  ;;  %v1462_v6 = vld [vmem:[%s2994_s2 + $0xb0] sm:$0xff]  ;;  %v1461_v10 = vld [vmem:[%s2994_s2 + $0xa8] sm:$0xff]  ;;  %s1431_s25 = sshll.u32 %s1772_s24, 5  ;;  %vm109_vm0 = vcmask 1046528   ;;  %s1772_s24 = sphi %s1864_s24, %s61_s24  }
   0x4   : > { %v91_v3 = vld [vmem:[%s2994_s2 + $0x58] sm:$0xff]  ;;  %209 = vmatpush.msra.mxu2 %v1463_v2  ;;  %v90_v7 = vld [vmem:[%s2994_s2 + $0x50] sm:$0xff]  ;;  %v89_v11 = vld [vmem:[%s2994_s2 + $0x48] sm:$0xff]  ;;  %s3014_s29 = sld [smem:[#allocation2_spill]]  ;;  %vm117_vm1 = vcmask 785408   ;;  %vm276_vm2 = vcmask 1045504   ;;  %s1416_s20 = scalar_lea.vmem %s3009_s17, %s1772_s24 }
   0x5   : > { %238 = vmatpush.msra.mxu3 %v91_v3  ;;  %v1460_v14 = vld [vmem:[%s2994_s2 + $0xa0] sm:$0xff]  ;;  %v1459_v18 = vld [vmem:[%s2994_s2 + $0x98] sm:$0xff]  ;;  %v1458_v22 = vld [vmem:[%s2994_s2 + $0x90] sm:$0xff]  ;;  %vm384_vm3 = vcmask 1044480   ;;  %vm492_vm4 = vcmask 1043456   ;;  %vm605_vm5 = vcmask 228352  }
   0x6   : > { %210 = vmatpush.msra.mxu2 %v1462_v6  ;;  %v88_v15 = vld [vmem:[%s2994_s2 + $0x40] sm:$0xff]  ;;  %v87_v19 = vld [vmem:[%s2994_s2 + $0x38] sm:$0xff]  ;;  %v86_v23 = vld [vmem:[%s2994_s2 + $0x30] sm:$0xff]  ;;  %vm710_vm6 = vcmask 687104   ;;  %vm1111_vm7 = vcmask 1041408   ;;  %vm1107_vm8 = vcmask 80896  }
   0x7   : > { %239 = vmatpush.msra.mxu3 %v90_v7  ;;  %v1457_v26 = vld [vmem:[%s2994_s2 + $0x88] sm:$0xff]  ;;  %v1456_v30 = vld [vmem:[%s2994_s2 + $0x80] sm:$0xff]  ;;  %v1455_v34 = vld [vmem:[%s2994_s2 + $0x78] sm:$0xff]  ;;  %vm1171_vm9 = vcmask 654336   ;;  %vm1353_vm10 = vcmask 982016   ;;  %vm1417_vm11 = vcmask 73728  }
   0x8   : > { %211 = vmatpush.msra.mxu2 %v1461_v10  ;;  %v85_v27 = vld [vmem:[%s2994_s2 + $0x28] sm:$0xff]  ;;  %v84_v31 = vld [vmem:[%s2994_s2 + $0x20] sm:$0xff]  ;;  %v83_v35 = vld [vmem:[%s2994_s2 + $0x18] sm:$0xff]  ;;  %s61_s24 = sadd.s32 1, %s1772_s24  }
   0x9   : > { %v1443_v0 = vld [vmem:[%s3013_s27 + $0xb8] sm:$0xff]  ;;  %v1442_v4 = vld [vmem:[%s3013_s27 + $0xb0] sm:$0xff]  ;;  %v1441_v8 = vld [vmem:[%s3013_s27 + $0xa8] sm:$0xff]  ;;  %240 = vmatpush.msra.mxu3 %v89_v11  ;;  %p58_p0 = scmp.ge.s32.totalorder %s61_s24, 8  }
   0xa   : > { %v79_v1 = vld [vmem:[%s3013_s27 + $0x58] sm:$0xff]  ;;  %130 = vmatpush.msra.mxu0 %v1443_v0  ;;  %v78_v5 = vld [vmem:[%s3013_s27 + $0x50] sm:$0xff]  ;;  %v77_v9 = vld [vmem:[%s3013_s27 + $0x48] sm:$0xff]  ;;  %212 = vmatpush.msra.mxu2 %v1460_v14  ;;  %s1969_s0 = scalar_lea.vmem %s3014_s29, %s1431_s25 }
   0xb   : > { %167 = vmatpush.msra.mxu1 %v79_v1  ;;  %v1440_v12 = vld [vmem:[%s3013_s27 + $0xa0] sm:$0xff]  ;;  %v1439_v16 = vld [vmem:[%s3013_s27 + $0x98] sm:$0xff]  ;;  %241 = vmatpush.msra.mxu3 %v88_v15  ;;  %v1438_v20 = vld [vmem:[%s3013_s27 + $0x90] sm:$0xff] }
   0xc   : > { %131 = vmatpush.msra.mxu0 %v1442_v4  ;;  %v76_v13 = vld [vmem:[%s3013_s27 + $0x40] sm:$0xff]  ;;  %v75_v17 = vld [vmem:[%s3013_s27 + $0x38] sm:$0xff]  ;;  %v74_v21 = vld [vmem:[%s3013_s27 + $0x30] sm:$0xff]  ;;  %213 = vmatpush.msra.mxu2 %v1459_v18 }
   0xd   : > { %168 = vmatpush.msra.mxu1 %v78_v5  ;;  %242 = vmatpush.msra.mxu3 %v87_v19  ;;  %v1437_v24 = vld [vmem:[%s3013_s27 + $0x88] sm:$0xff]  ;;  %v1436_v28 = vld [vmem:[%s3013_s27 + $0x80] sm:$0xff]  ;;  %v1435_v32 = vld [vmem:[%s3013_s27 + $0x78] sm:$0xff] }
   0xe   : > { %132 = vmatpush.msra.mxu0 %v1441_v8  ;;  %v73_v25 = vld [vmem:[%s3013_s27 + $0x28] sm:$0xff]  ;;  %214 = vmatpush.msra.mxu2 %v1458_v22  ;;  %v72_v29 = vld [vmem:[%s3013_s27 + $0x20] sm:$0xff]  ;;  %v71_v33 = vld [vmem:[%s3013_s27 + $0x18] sm:$0xff] }
   0xf   : > { %169 = vmatpush.msra.mxu1 %v77_v9  ;;  %243 = vmatpush.msra.mxu3 %v86_v23  ;;  %v1434_v36 = vld [vmem:[%s3013_s27 + $0x70] sm:$0xff]  ;;  %v1990_v38 = vld [vmem:[%s1969_s0] sm:$0xff]  ;;  %v1993_v39 = vld [vmem:[%s1969_s0 + $0x8] sm:$0xff] }
  0x10   : > { %133 = vmatpush.msra.mxu0 %v1440_v12  ;;  %215 = vmatpush.msra.mxu2 %v1457_v26  ;;  %v70_v37 = vld [vmem:[%s3013_s27 + $0x10] sm:$0xff]  ;;  %v1433_v42 = vld [vmem:[%s3013_s27 + $0x68] sm:$0xff]  ;;  %v110_v44 = vrot.slane %v1990_v38, 1  ;;  %v111_v45 = vrot.slane %v1993_v39, 1  ;;  %v1432_v48 = vld [vmem:[%s3013_s27 + $0x60] sm:$0xff] }
  0x11   : > { %170 = vmatpush.msra.mxu1 %v76_v13  ;;  %244 = vmatpush.msra.mxu3 %v85_v27  ;;  %v1454_v40 = vld [vmem:[%s2994_s2 + $0x70] sm:$0xff]  ;;  %v69_v43 = vld [vmem:[%s3013_s27 + $0x8] sm:$0xff]  ;;  %v68_v49 = vld [vmem:[%s3013_s27] sm:$0xff] }
  0x12   : > { %134 = vmatpush.msra.mxu0 %v1439_v16  ;;  %216 = vmatpush.msra.mxu2 %v1456_v30  ;;  %v82_v41 = vld [vmem:[%s2994_s2 + $0x10] sm:$0xff]  ;;  %v1453_v46 = vld [vmem:[%s2994_s2 + $0x68] sm:$0xff]  ;;  %v1452_v50 = vld [vmem:[%s2994_s2 + $0x60] sm:$0xff]  ;;  %v112_v52 = vsel %vm109_vm0, %v110_v44, %v111_v45  ;;  %v386_v44 = vrot.slane %v1993_v39, 3 }
  0x13   : > { %171 = vmatpush.msra.mxu1 %v75_v17  ;;  %245 = vmatpush.msra.mxu3 %v84_v31  ;;  %v81_v47 = vld [vmem:[%s2994_s2 + $0x8] sm:$0xff]  ;;  %v80_v51 = vld [vmem:[%s2994_s2] sm:$0xff]  ;;  %v2029_v53 = vld [vmem:[%s1969_s0 + $0x10] sm:$0xff] }
  0x14   : > { %135 = vmatpush.msra.mxu0 %v1438_v20  ;;  %217 = vmatpush.msra.mxu2 %v1455_v34  ;;  %v1483_v54 = vld [vmem:[%s3013_s27 + $0x118] sm:$0xff]  ;;  %v113_v58 = vrot.slane %v2029_v53, 1  ;;  %v1482_v59 = vld [vmem:[%s3013_s27 + $0x110] sm:$0xff]  ;;  %v1481_v63 = vld [vmem:[%s3013_s27 + $0x108] sm:$0xff] }
  0x15   : > { %172 = vmatpush.msra.mxu1 %v74_v21  ;;  %246 = vmatpush.msra.mxu3 %v83_v35  ;;  %v1499_v55 = vld [vmem:[%s2994_s2 + $0x118] sm:$0xff]  ;;  %v1498_v60 = vld [vmem:[%s2994_s2 + $0x110] sm:$0xff]  ;;  %v1497_v0 = vld [vmem:[%s2994_s2 + $0x108] sm:$0xff] }
  0x16   : > { %136 = vmatpush.msra.mxu0 %v1437_v24  ;;  %218 = vmatpush.msra.mxu2 %v1454_v40  ;;  %v1515_v56 = vld [vmem:[%s3013_s27 + $0x178] sm:$0xff]  ;;  %v1514_v61 = vld [vmem:[%s3013_s27 + $0x170] sm:$0xff]  ;;  %v1513_v1 = vld [vmem:[%s3013_s27 + $0x168] sm:$0xff]  ;;  %v114_v3 = vsel %vm109_vm0, %v111_v45, %v113_v58  ;;  %v278_v40 = vrot.slane %v1993_v39, 2 }
  0x17   : > { %173 = vmatpush.msra.mxu1 %v73_v25  ;;  %247 = vmatpush.msra.mxu3 %v82_v41  ;;  %v1531_v57 = vld [vmem:[%s2994_s2 + $0x178] sm:$0xff]  ;;  %v1530_v62 = vld [vmem:[%s2994_s2 + $0x170] sm:$0xff]  ;;  %v1529_v2 = vld [vmem:[%s2994_s2 + $0x168] sm:$0xff] }
  0x18   : > { %137 = vmatpush.msra.mxu0 %v1436_v28  ;;  %219 = vmatpush.msra.mxu2 %v1453_v46  ;;  %v2076_v4 = vld [vmem:[%s1969_s0 + $0x18] sm:$0xff]  ;;  %v1480_v5 = vld [vmem:[%s3013_s27 + $0x100] sm:$0xff]  ;;  %v1478_v14 = vld [vmem:[%s3013_s27 + $0xf0] sm:$0xff] }
  0x19   : > { %174 = vmatpush.msra.mxu1 %v72_v29  ;;  %248 = vmatpush.msra.mxu3 %v81_v47  ;;  %v1496_v6 = vld [vmem:[%s2994_s2 + $0x100] sm:$0xff]  ;;  %v115_v9 = vrot.slane %v2076_v4, 1  ;;  %v1479_v10 = vld [vmem:[%s3013_s27 + $0xf8] sm:$0xff]  ;;  %v1494_v15 = vld [vmem:[%s2994_s2 + $0xf0] sm:$0xff] }
  0x1a   : > { %138 = vmatpush.msra.mxu0 %v1435_v32  ;;  %220 = vmatpush.msra.mxu2 %v1452_v50  ;;  %v1512_v7 = vld [vmem:[%s3013_s27 + $0x160] sm:$0xff]  ;;  %v1495_v11 = vld [vmem:[%s2994_s2 + $0xf8] sm:$0xff]  ;;  %v1510_v16 = vld [vmem:[%s3013_s27 + $0x150] sm:$0xff] }
  0x1b   : > { %175 = vmatpush.msra.mxu1 %v71_v33  ;;  %249 = vmatpush.msra.mxu3 %v80_v51  ;;  %v1528_v8 = vld [vmem:[%s2994_s2 + $0x160] sm:$0xff]  ;;  %v1511_v12 = vld [vmem:[%s3013_s27 + $0x158] sm:$0xff]  ;;  %v1526_v17 = vld [vmem:[%s2994_s2 + $0x150] sm:$0xff]  ;;  %v116_v18 = vsel %vm109_vm0, %v113_v58, %v115_v9  ;;  %v493_v51 = vrot.slane %v1990_v38, 4  ;;  %v388_v58 = vrot.slane %v2029_v53, 3 }
  0x1c   : > { %139 = vmatpush.msra.mxu0 %v1434_v36  ;;  %1464 = vmatmul.msk.f32.vlgmr.msra.gmra.mxu2 %vm117_vm1, %v112_v52  ;;  %v1527_v13 = vld [vmem:[%s2994_s2 + $0x158] sm:$0xff]  ;;  %v1477_v19 = vld [vmem:[%s3013_s27 + $0xe8] sm:$0xff]  ;;  %v1476_v23 = vld [vmem:[%s3013_s27 + $0xe0] sm:$0xff] }
  0x1d   : > { %176 = vmatpush.msra.mxu1 %v70_v37  ;;  %1468 = vmatmul.msk.f32.vlgmr.msra.gmra.mxu3 %vm117_vm1, %v1990_v38  ;;  %v1493_v20 = vld [vmem:[%s2994_s2 + $0xe8] sm:$0xff]  ;;  %v1492_v24 = vld [vmem:[%s2994_s2 + $0xe0] sm:$0xff]  ;;  %v1475_v27 = vld [vmem:[%s3013_s27 + $0xd8] sm:$0xff]  ;;  %v277_v37 = vrot.slane %v1990_v38, 2 }
  0x1e   : > { %140 = vmatpush.msra.mxu0 %v1433_v42  ;;  %404 = vmatpush.msrb.mxu2 %v1515_v56  ;;  %v1509_v21 = vld [vmem:[%s3013_s27 + $0x148] sm:$0xff]  ;;  %v1508_v25 = vld [vmem:[%s3013_s27 + $0x140] sm:$0xff]  ;;  %v1491_v28 = vld [vmem:[%s2994_s2 + $0xd8] sm:$0xff] }
  0x1f   : > { %177 = vmatpush.msra.mxu1 %v69_v43  ;;  %450 = vmatpush.msrb.mxu3 %v1531_v57  ;;  %v1525_v22 = vld [vmem:[%s2994_s2 + $0x148] sm:$0xff]  ;;  %v1524_v26 = vld [vmem:[%s2994_s2 + $0x140] sm:$0xff]  ;;  %v1507_v29 = vld [vmem:[%s3013_s27 + $0x138] sm:$0xff]  ;;  %v385_v43 = vrot.slane %v1990_v38, 3  ;;  %v496_v57 = vrot.slane %v2029_v53, 4 }
  0x20   : > { %141 = vmatpush.msra.mxu0 %v1432_v48  ;;  %405 = vmatpush.msrb.mxu2 %v1514_v61  ;;  %v1523_v30 = vld [vmem:[%s2994_s2 + $0x138] sm:$0xff]  ;;  %v1474_v31 = vld [vmem:[%s3013_s27 + $0xd0] sm:$0xff]  ;;  %v1473_v35 = vld [vmem:[%s3013_s27 + $0xc8] sm:$0xff] }
  0x21   : > { %178 = vmatpush.msra.mxu1 %v68_v49  ;;  %1444 = vmatmul.msk.f32.vlgmr.msra.gmra.mxu0 %vm117_vm1, %v112_v52  ;;  %v1490_v32 = vld [vmem:[%s2994_s2 + $0xd0] sm:$0xff]  ;;  %v1489_v36 = vld [vmem:[%s2994_s2 + $0xc8] sm:$0xff]  ;;  %v1472_v45 = vld [vmem:[%s3013_s27 + $0xc0] sm:$0xff]  ;;  %v279_v49 = vsel %vm276_vm2, %v277_v37, %v278_v40  ;;  %v387_v50 = vsel %vm384_vm3, %v385_v43, %v386_v44  ;;  %v494_v52 = vrot.slane %v1993_v39, 4 }
  0x22   : > { %1448 = vmatmul.msk.f32.vlgmr.msra.gmra.mxu1 %vm117_vm1, %v1990_v38  ;;  %296 = vmatpush.msrb.mxu0 %v1483_v54  ;;  %v1506_v33 = vld [vmem:[%s3013_s27 + $0x130] sm:$0xff]  ;;  %v1505_v41 = vld [vmem:[%s3013_s27 + $0x128] sm:$0xff]  ;;  %v1488_v46 = vld [vmem:[%s2994_s2 + $0xc0] sm:$0xff]  ;;  %v280_v38 = vrot.slane %v2029_v53, 2 }
  0x23   : > { %342 = vmatpush.msrb.mxu1 %v1499_v55  ;;  %451 = vmatpush.msrb.mxu3 %v1530_v62  ;;  %v1522_v34 = vld [vmem:[%s2994_s2 + $0x130] sm:$0xff]  ;;  %v1521_v42 = vld [vmem:[%s2994_s2 + $0x128] sm:$0xff]  ;;  %v1504_v47 = vld [vmem:[%s3013_s27 + $0x120] sm:$0xff]  ;;  %v2223_v56 = vsel %vm492_vm4, %v493_v51, %v494_v52  ;;  %v2242_v61 = vsel %vm492_vm4, %v494_v52, %v496_v57 }
  0x24   : > { %297 = vmatpush.msrb.mxu0 %v1482_v59  ;;  %406 = vmatpush.msrb.mxu2 %v1513_v1  ;;  %v1520_v48 = vld [vmem:[%s2994_s2 + $0x120] sm:$0xff]  ;;  %v1547_v54 = vld [vmem:[%s3013_s27 + $0x1d8] sm:$0xff]  ;;  %v1562_v59 = vld [vmem:[%s2994_s2 + $0x1d0] sm:$0xff] }
  0x25   : > { %343 = vmatpush.msrb.mxu1 %v1498_v60  ;;  %452 = vmatpush.msrb.mxu3 %v1529_v2  ;;  %v1563_v55 = vld [vmem:[%s2994_s2 + $0x1d8] sm:$0xff]  ;;  %v1545_v60 = vld [vmem:[%s3013_s27 + $0x1c8] sm:$0xff]  ;;  %v1544_v1 = vld [vmem:[%s3013_s27 + $0x1c0] sm:$0xff] }
  0x26   : > { %298 = vmatpush.msrb.mxu0 %v1481_v63  ;;  %1465 = vmatmul.msk.f32.gmra.mxu2 %vm117_vm1, %v114_v3  ;;  %v1561_v62 = vld [vmem:[%s2994_s2 + $0x1c8] sm:$0xff]  ;;  %v281_v63 = vsel %vm276_vm2, %v278_v40, %v280_v38  ;;  %v1560_v2 = vld [vmem:[%s2994_s2 + $0x1c0] sm:$0xff] }
  0x27   : > { %344 = vmatpush.msrb.mxu1 %v1497_v0  ;;  %1469 = vmatmul.msk.f32.gmra.mxu3 %vm117_vm1, %v1993_v39  ;;  %v389_v0 = vsel %vm384_vm3, %v386_v44, %v388_v58 }
  0x28   : > { %299 = vmatpush.msrb.mxu0 %v1480_v5  ;;  %407 = vmatpush.msrb.mxu2 %v1512_v7  ;;  %v1543_v5 = vld [vmem:[%s3013_s27 + $0x1b8] sm:$0xff] }
  0x29   : > { %1445 = vmatmul.msk.f32.gmra.mxu0 %vm117_vm1, %v114_v3  ;;  %345 = vmatpush.msrb.mxu1 %v1496_v6  ;;  %v282_v3 = vrot.slane %v2076_v4, 2  ;;  %v390_v6 = vrot.slane %v2076_v4, 3  ;;  %v1559_v7 = vld [vmem:[%s2994_s2 + $0x1b8] sm:$0xff] }
  0x2a   : > { %1449 = vmatmul.msk.f32.gmra.mxu1 %vm117_vm1, %v1993_v39  ;;  %453 = vmatpush.msrb.mxu3 %v1528_v8  ;;  %v1546_v39 = vld [vmem:[%s3013_s27 + $0x1d0] sm:$0xff] }
  0x2b   : > { %300 = vmatpush.msrb.mxu0 %v1479_v10  ;;  %346 = vmatpush.msrb.mxu1 %v1495_v11  ;;  %v1542_v8 = vld [vmem:[%s3013_s27 + $0x1b0] sm:$0xff]  ;;  %v283_v10 = vsel %vm276_vm2, %v280_v38, %v282_v3  ;;  %v391_v11 = vsel %vm384_vm3, %v388_v58, %v390_v6 }
  0x2c   : > { %408 = vmatpush.msrb.mxu2 %v1511_v12  ;;  %454 = vmatpush.msrb.mxu3 %v1527_v13  ;;  %v1541_v12 = vld [vmem:[%s3013_s27 + $0x1a8] sm:$0xff] }
  0x2d   : > { %301 = vmatpush.msrb.mxu0 %v1478_v14  ;;  %347 = vmatpush.msrb.mxu1 %v1494_v15  ;;  %v1557_v13 = vld [vmem:[%s2994_s2 + $0x1a8] sm:$0xff]  ;;  %v1540_v14 = vld [vmem:[%s3013_s27 + $0x1a0] sm:$0xff] }
  0x2e   : > { %409 = vmatpush.msrb.mxu2 %v1510_v16  ;;  %455 = vmatpush.msrb.mxu3 %v1526_v17  ;;  %v1556_v15 = vld [vmem:[%s2994_s2 + $0x1a0] sm:$0xff]  ;;  %v1539_v16 = vld [vmem:[%s3013_s27 + $0x198] sm:$0xff] }
  0x2f   : > { %1466 = vmatmul.msk.f32.gmra.mxu2 %vm117_vm1, %v116_v18  ;;  %1470 = vmatmul.msk.f32.gmra.mxu3 %vm117_vm1, %v2029_v53  ;;  %v1555_v17 = vld [vmem:[%s2994_s2 + $0x198] sm:$0xff] }
  0x30   : > { %302 = vmatpush.msrb.mxu0 %v1477_v19  ;;  %348 = vmatpush.msrb.mxu1 %v1493_v20  ;;  %v1554_v19 = vld [vmem:[%s2994_s2 + $0x190] sm:$0xff]  ;;  %v1537_v20 = vld [vmem:[%s3013_s27 + $0x188] sm:$0xff] }
  0x31   : > { %1446 = vmatmul.msk.f32.gmra.mxu0 %vm117_vm1, %v116_v18  ;;  %410 = vmatpush.msrb.mxu2 %v1509_v21  ;;  %v1538_v18 = vld [vmem:[%s3013_s27 + $0x190] sm:$0xff]  ;;  %v1553_v21 = vld [vmem:[%s2994_s2 + $0x188] sm:$0xff] }
  0x32   : > { %1450 = vmatmul.msk.f32.gmra.mxu1 %vm117_vm1, %v2029_v53  ;;  %456 = vmatpush.msrb.mxu3 %v1525_v22  ;;  %v1536_v22 = vld [vmem:[%s3013_s27 + $0x180] sm:$0xff] }
  0x33   : > { %303 = vmatpush.msrb.mxu0 %v1476_v23  ;;  %349 = vmatpush.msrb.mxu1 %v1492_v24  ;;  %v1552_v23 = vld [vmem:[%s2994_s2 + $0x180] sm:$0xff]  ;;  %v498_v24 = vrot.slane %v2076_v4, 4 }
  0x34   : > { %411 = vmatpush.msrb.mxu2 %v1508_v25  ;;  %457 = vmatpush.msrb.mxu3 %v1524_v26 }
  0x35   : > { %304 = vmatpush.msrb.mxu0 %v1475_v27  ;;  %350 = vmatpush.msrb.mxu1 %v1491_v28 }
  0x36   : > { %412 = vmatpush.msrb.mxu2 %v1507_v29  ;;  %458 = vmatpush.msrb.mxu3 %v1523_v30 }
  0x37   : > { %1467 = vmatmul.msk.f32.gmra.mxu2 %vm117_vm1, %v115_v9  ;;  %1471 = vmatmul.msk.f32.gmra.mxu3 %vm117_vm1, %v2076_v4 }
  0x38   : > { %305 = vmatpush.msrb.mxu0 %v1474_v31  ;;  %351 = vmatpush.msrb.mxu1 %v1490_v32 }
  0x39   : > { %1447 = vmatmul.msk.f32.gmra.mxu0 %vm117_vm1, %v115_v9  ;;  %413 = vmatpush.msrb.mxu2 %v1506_v33  ;;  %v1558_v9 = vld [vmem:[%s2994_s2 + $0x1b0] sm:$0xff] }
  0x3a   : > { %1451 = vmatmul.msk.f32.gmra.mxu1 %vm117_vm1, %v2076_v4  ;;  %459 = vmatpush.msrb.mxu3 %v1522_v34  ;;  %v499_v4 = vsel %vm492_vm4, %v496_v57, %v498_v24 }
  0x3b   : > { %306 = vmatpush.msrb.mxu0 %v1473_v35  ;;  %352 = vmatpush.msrb.mxu1 %v1489_v36 }
  0x3c   : > { %414 = vmatpush.msrb.mxu2 %v1505_v41  ;;  %460 = vmatpush.msrb.mxu3 %v1521_v42 }
  0x3d   : > { %307 = vmatpush.msrb.mxu0 %v1472_v45  ;;  %353 = vmatpush.msrb.mxu1 %v1488_v46 }
  0x3e   : > { %415 = vmatpush.msrb.mxu2 %v1504_v47  ;;  %461 = vmatpush.msrb.mxu3 %v1520_v48 }
  0x3f   : > { %1516 = vmatmul.msk.f32.vlgmr.msrb.gmra.mxu2 %vm117_vm1, %v387_v50  ;;  %1532 = vmatmul.msk.f32.vlgmr.msrb.gmra.mxu3 %vm117_vm1, %v387_v50 }
  0x40   : > { %512 = vmatpush.msra.mxu0 %v1547_v54  ;;  %1744 = vmatpush.msra.mxu3 %v1547_v54 }
  0x41   : > { %1484 = vmatmul.msk.f32.vlgmr.msrb.gmra.mxu0 %vm117_vm1, %v279_v49  ;;  %558 = vmatpush.msra.mxu1 %v1563_v55 }
  0x42   : > { %1500 = vmatmul.msk.f32.vlgmr.msrb.gmra.mxu1 %vm117_vm1, %v279_v49  ;;  %513 = vmatpush.msra.mxu0 %v1546_v39 }
  0x43   : > { %1745 = vmatpush.msra.mxu3 %v1546_v39  ;;  %559 = vmatpush.msra.mxu1 %v1562_v59 }
  0x44   : > { %514 = vmatpush.msra.mxu0 %v1545_v60 }
  0x45   : > { %1746 = vmatpush.msra.mxu3 %v1545_v60  ;;  %560 = vmatpush.msra.mxu1 %v1561_v62 }
  0x46   : > { %515 = vmatpush.msra.mxu0 %v1544_v1 }
  0x47   : > { %1517 = vmatmul.msk.f32.gmra.mxu2 %vm117_vm1, %v389_v0  ;;  %1533 = vmatmul.msk.f32.gmra.mxu3 %vm117_vm1, %v389_v0 }
  0x48   : > { %1747 = vmatpush.msra.mxu3 %v1544_v1  ;;  %561 = vmatpush.msra.mxu1 %v1560_v2 }
  0x49   : > { %1485 = vmatmul.msk.f32.gmra.mxu0 %vm117_vm1, %v281_v63 }
  0x4a   : > { %1501 = vmatmul.msk.f32.gmra.mxu1 %vm117_vm1, %v281_v63  ;;  %516 = vmatpush.msra.mxu0 %v1543_v5 }
  0x4b   : > { %1748 = vmatpush.msra.mxu3 %v1543_v5  ;;  %562 = vmatpush.msra.mxu1 %v1559_v7 }
  0x4c   : > { %517 = vmatpush.msra.mxu0 %v1542_v8 }
  0x4d   : > { %1749 = vmatpush.msra.mxu3 %v1542_v8  ;;  %563 = vmatpush.msra.mxu1 %v1558_v9 }
  0x4e   : > { %518 = vmatpush.msra.mxu0 %v1541_v12 }
  0x4f   : > { %1518 = vmatmul.msk.f32.gmra.mxu2 %vm117_vm1, %v391_v11  ;;  %1534 = vmatmul.msk.f32.gmra.mxu3 %vm117_vm1, %v391_v11 }
  0x50   : > { %1750 = vmatpush.msra.mxu3 %v1541_v12  ;;  %564 = vmatpush.msra.mxu1 %v1557_v13  ;;  %v692_v13 = vld [vmem:[%s2999_s7 + $0x50] sm:$0xf] }
  0x51   : > { %1486 = vmatmul.msk.f32.gmra.mxu0 %vm117_vm1, %v283_v10 }
  0x52   : > { %1502 = vmatmul.msk.f32.gmra.mxu1 %vm117_vm1, %v283_v10  ;;  %519 = vmatpush.msra.mxu0 %v1540_v14 }
  0x53   : > { %1751 = vmatpush.msra.mxu3 %v1540_v14  ;;  %565 = vmatpush.msra.mxu1 %v1556_v15 }
  0x54   : > { %520 = vmatpush.msra.mxu0 %v1539_v16 }
  0x55   : > { %1752 = vmatpush.msra.mxu3 %v1539_v16  ;;  %566 = vmatpush.msra.mxu1 %v1555_v17  ;;  %v691_v17 = vld [vmem:[%s2999_s7 + $0x48] sm:$0xff] }
  0x56   : > { %521 = vmatpush.msra.mxu0 %v1538_v18 }
  0x57   : > { %1519 = vmatmul.msk.f32.gmra.mxu2 %vm117_vm1, %v390_v6  ;;  %1535 = vmatmul.msk.f32.gmra.mxu3 %vm117_vm1, %v390_v6 }
  0x58   : > { %1753 = vmatpush.msra.mxu3 %v1538_v18  ;;  %567 = vmatpush.msra.mxu1 %v1554_v19 }
  0x59   : > { %1487 = vmatmul.msk.f32.gmra.mxu0 %vm117_vm1, %v282_v3 }
  0x5a   : > { %1503 = vmatmul.msk.f32.gmra.mxu1 %vm117_vm1, %v282_v3  ;;  %522 = vmatpush.msra.mxu0 %v1537_v20 }
  0x5b   : > { %1754 = vmatpush.msra.mxu3 %v1537_v20  ;;  %568 = vmatpush.msra.mxu1 %v1553_v21 }
  0x5c   : > { %523 = vmatpush.msra.mxu0 %v1536_v22 }
  0x5d   : > { %1755 = vmatpush.msra.mxu3 %v1536_v22  ;;  %569 = vmatpush.msra.mxu1 %v1552_v23  ;;  %v690_v22 = vld [vmem:[%s2999_s7 + $0x40] sm:$0xff] }
  0x5f   : > { %1551 = vmatmul.msk.f32.vlgmr.msra.gmra.mxu3 %vm117_vm1, %v498_v24  ;;  %1605 = vmatpush.msk.msrb.mxu1 %vm492_vm4, %v692_v13  ;;  %v677_v13 = vld [vmem:[%s2998_s6 + $0x30] sm:$0xff] }
  0x61   : > { %1548 = vmatmul.msk.f32.vlgmr.msra.gmra.mxu0 %vm117_vm1, %v2223_v56  ;;  %818 = vmatpush.msrb.mxu1 %v691_v17  ;;  %v675_v17 = vld [vmem:[%s2998_s6 + $0x20] sm:$0xff] }
  0x62   : > { %1564 = vmatmul.msk.f32.vlgmr.msra.gmra.mxu1 %vm117_vm1, %v2223_v56 }
  0x63   : > { %819 = vmatpush.msrb.mxu1 %v690_v22  ;;  %v1576_v22 = vld [vmem:[%s2998_s6 + $0x68] sm:$0xff] }
  0x69   : > { %1549 = vmatmul.msk.f32.gmra.mxu0 %vm117_vm1, %v2242_v61 }
  0x6a   : > { %1565 = vmatmul.msk.f32.gmra.mxu1 %vm117_vm1, %v2242_v61 }
  0x71   : > { %1550 = vmatmul.msk.f32.gmra.mxu0 %vm117_vm1, %v499_v4 }
  0x72   : > { %1566 = vmatmul.msk.f32.gmra.mxu1 %vm117_vm1, %v499_v4 }
  0x7a   : > { %1567 = vmatmul.msk.f32.gmra.mxu1 %vm117_vm1, %v498_v24 }
  0x9e   : > { %v143_v25 = vpop.f32.mrf.mxu0 }
  0x9f   : > { %v180_v26 = vpop.f32.mrf.mxu1  ;;  %v222_v32 = vpop.f32.mrf.mxu2 }
  0xa0   : > { %v181_v27 = vadd.f32 %v180_v26, %v143_v25  ;;  %v251_v28 = vpop.f32.mrf.mxu3 }
  0xa1   : > { %v252_v56 = vadd.f32 %v251_v28, %v222_v32 }
  0xa6   : > { %v146_v29 = vpop.f32.mrf.mxu0 }
  0xa7   : > { %v183_v30 = vpop.f32.mrf.mxu1 }
  0xa8   : > { %v184_v31 = vadd.f32 %v183_v30, %v146_v29  ;;  %v689_v29 = vld [vmem:[%s2999_s7 + $0x38] sm:$0xff] }
  0xa9   : > { %v225_v53 = vpop.f32.mrf.mxu2  ;;  %820 = vmatpush.msrb.mxu1 %v689_v29  ;;  %v1659_v29 = vld [vmem:[%s2999_s7 + $0x150] sm:$0xff] }
  0xaa   : > { %v254_v33 = vpop.f32.mrf.mxu3 }
  0xab   : > { %v255_v9 = vadd.f32 %v254_v33, %v225_v53 }
  0xae   : > { %v149_v34 = vpop.f32.mrf.mxu0 }
  0xaf   : > { %v186_v35 = vpop.f32.mrf.mxu1 }
  0xb0   : > { %v187_v7 = vadd.f32 %v186_v35, %v149_v34  ;;  %v688_v35 = vld [vmem:[%s2999_s7 + $0x30] sm:$0xff] }
  0xb1   : > { %821 = vmatpush.msrb.mxu1 %v688_v35  ;;  %v1627_v35 = vld [vmem:[%s2999_s7 + $0xd8] sm:$0xff] }
  0xb2   : > { %v257_v40 = vpop.f32.mrf.mxu3  ;;  %v228_v43 = vpop.f32.mrf.mxu2 }
  0xb3   : > { %v258_v8 = vadd.f32 %v257_v40, %v228_v43 }
  0xb6   : > { %v152_v36 = vpop.f32.mrf.mxu0 }
  0xb7   : > { %v189_v37 = vpop.f32.mrf.mxu1 }
  0xb8   : > { %v190_v18 = vadd.f32 %v189_v37, %v152_v36 }
  0xba   : > { %v260_v44 = vpop.f32.mrf.mxu3  ;;  %v231_v47 = vpop.f32.mrf.mxu2 }
  0xbb   : > { %v261_v19 = vadd.f32 %v260_v44, %v231_v47  ;;  %v1600_v47 = vld [vmem:[%s2999_s7 + $0xa0] sm:$0xff] }
  0xbe   : > { %v309_v41 = vpop.f32.mrf.mxu0 }
  0xbf   : > { %v355_v42 = vpop.f32.mrf.mxu1  ;;  %v321_v38 = vadd.f32 %v309_v41, %v181_v27  ;;  %v687_v41 = vld [vmem:[%s2999_s7 + $0x28] sm:$0xff] }
  0xc0   : > { %v367_v39 = vadd.f32 %v355_v42, %v252_v56  ;;  %v1601_v42 = vld [vmem:[%s2999_s7 + $0xa8] sm:$0xf]  ;;  %822 = vmatpush.msrb.mxu1 %v687_v41  ;;  %v684_v56 = vld [vmem:[%s2999_s7 + $0x10] sm:$0xff]  ;;  %v1592_v41 = vld [vmem:[%s2999_s7 + $0x60] sm:$0xff] }
  0xc1   : > { %1602 = vmatpush.msk.msrb.mxu0 %vm492_vm4, %v1601_v42  ;;  %v1617_v42 = vld [vmem:[%s2998_s6 + $0xf8] sm:$0xff] }
  0xc2   : > { %v463_v48 = vpop.f32.mrf.mxu3  ;;  %v417_v51 = vpop.f32.mrf.mxu2 }
  0xc3   : > { %v429_v57 = vadd.f32 %v417_v51, %v321_v38  ;;  %v475_v58 = vadd.f32 %v463_v48, %v367_v39  ;;  %792 = vmatpush.msrb.mxu0 %v1600_v47  ;;  %v1599_v51 = vld [vmem:[%s2999_s7 + $0x98] sm:$0xff]  ;;  %v1597_v38 = vld [vmem:[%s2999_s7 + $0x88] sm:$0xff]  ;;  %v1655_v47 = vld [vmem:[%s2999_s7 + $0x130] sm:$0xff] }
  0xc5   : > { %793 = vmatpush.msrb.mxu0 %v1599_v51  ;;  %v1654_v51 = vld [vmem:[%s2999_s7 + $0x128] sm:$0xff] }
  0xc6   : > { %v312_v45 = vpop.f32.mrf.mxu0 }
  0xc7   : > { %v358_v46 = vpop.f32.mrf.mxu1  ;;  %v322_v14 = vadd.f32 %v312_v45, %v184_v31  ;;  %v1764_v45 = vld [vmem:[%s2995_s3] ss:$0 sm:$0xff] }
  0xc8   : > { %v368_v15 = vadd.f32 %v358_v46, %v255_v9  ;;  %v686_v46 = vld [vmem:[%s2999_s7 + $0x20] sm:$0xff]  ;;  %v678_v9 = vld [vmem:[%s2998_s6 + $0x38] sm:$0xff] }
  0xc9   : > { %823 = vmatpush.msrb.mxu1 %v686_v46  ;;  %v1616_v46 = vld [vmem:[%s2998_s6 + $0xf0] sm:$0xff] }
  0xca   : > { %v466_v52 = vpop.f32.mrf.mxu3  ;;  %v420_v59 = vpop.f32.mrf.mxu2 }
  0xcb   : > { %v430_v23 = vadd.f32 %v420_v59, %v322_v14  ;;  %v476_v24 = vadd.f32 %v466_v52, %v368_v15  ;;  %v1598_v52 = vld [vmem:[%s2999_s7 + $0x90] sm:$0xff]  ;;  %v1596_v59 = vld [vmem:[%s2999_s7 + $0x80] sm:$0xff]  ;;  %v1580_v14 = vld [vmem:[%s2998_s6 + $0x88] sm:$0xff] }
  0xcc   : > { %794 = vmatpush.msrb.mxu0 %v1598_v52  ;;  %v676_v15 = vld [vmem:[%s2998_s6 + $0x28] sm:$0xff]  ;;  %v1623_v52 = vld [vmem:[%s2999_s7 + $0xb8] sm:$0xff] }
  0xce   : > { %v315_v49 = vpop.f32.mrf.mxu0  ;;  %795 = vmatpush.msrb.mxu0 %v1597_v38  ;;  %v1622_v38 = vld [vmem:[%s2999_s7 + $0xb0] sm:$0xff] }
  0xcf   : > { %v361_v50 = vpop.f32.mrf.mxu1  ;;  %v323_v11 = vadd.f32 %v315_v49, %v187_v7  ;;  %v679_v7 = vld [vmem:[%s2998_s6 + $0x40] sm:$0xff] }
  0xd0   : > { %v369_v12 = vadd.f32 %v361_v50, %v258_v8  ;;  %v685_v50 = vld [vmem:[%s2999_s7 + $0x18] sm:$0xff]  ;;  %796 = vmatpush.msrb.mxu0 %v1596_v59  ;;  %v1643_v59 = vld [vmem:[%s2998_s6 + $0x140] sm:$0xff] }
  0xd1   : > { %824 = vmatpush.msrb.mxu1 %v685_v50  ;;  %v1582_v8 = vld [vmem:[%s2998_s6 + $0x98] sm:$0xff]  ;;  %v1615_v50 = vld [vmem:[%s2998_s6 + $0xe8] sm:$0xff] }
  0xd2   : > { %v469_v0 = vpop.f32.mrf.mxu3  ;;  %v423_v5 = vpop.f32.mrf.mxu2 }
  0xd3   : > { %v431_v20 = vadd.f32 %v423_v5, %v323_v11  ;;  %v477_v21 = vadd.f32 %v469_v0, %v369_v12  ;;  %825 = vmatpush.msrb.mxu1 %v684_v56  ;;  %v638_v0 = vld [vmem:[%s2997_s5] sm:$0xff]  ;;  %v680_v5 = vld [vmem:[%s2998_s6 + $0x48] sm:$0xff] }
  0xd4   : > { %v604_v11 = vld [vmem:[%s2996_s4 + $0x8] sm:$0x3f]  ;;  %v1653_v56 = vld [vmem:[%s2999_s7 + $0x120] sm:$0xff] }
  0xd5   : > { %v639_v12 = vld [vmem:[%s2997_s5 + $0x8] sm:$0x3f] }
  0xd6   : > { %v318_v54 = vpop.f32.mrf.mxu0 }
  0xd7   : > { %v364_v55 = vpop.f32.mrf.mxu1  ;;  %v324_v25 = vadd.f32 %v318_v54, %v190_v18  ;;  %v1578_v18 = vld [vmem:[%s2998_s6 + $0x78] sm:$0xff] }
  0xd8   : > { %v370_v26 = vadd.f32 %v364_v55, %v261_v19  ;;  %v674_v19 = vld [vmem:[%s2998_s6 + $0x18] sm:$0xff] }
  0xda   : > { %v472_v6 = vpop.f32.mrf.mxu3  ;;  %v426_v4 = vpop.f32.mrf.mxu2 }
  0xdb   : > { %v432_v31 = vadd.f32 %v426_v4, %v324_v25  ;;  %v478_v32 = vadd.f32 %v472_v6, %v370_v26  ;;  %v1583_v6 = vld [vmem:[%s2998_s6 + $0xa0] sm:$0xff]  ;;  %v1631_v25 = vld [vmem:[%s2999_s7 + $0xf8] sm:$0xff]  ;;  %v1630_v26 = vld [vmem:[%s2999_s7 + $0xf0] sm:$0xff] }
  0xdc   : > { %v1632_v4 = vld [vmem:[%s2999_s7 + $0x100] sm:$0xf] }
  0xde   : > { %v525_v60 = vpop.f32.mrf.mxu0 }
  0xdf   : > { %v571_v61 = vpop.f32.mrf.mxu1  ;;  %v2335_v62 = vadd.f32 %v525_v60, %v429_v57 }
  0xe0   : > { %v2337_v63 = vadd.f32 %v571_v61, %v475_v58  ;;  %v683_v58 = vld [vmem:[%s2999_s7 + $0x8] sm:$0xff]  ;;  %v682_v61 = vld [vmem:[%s2999_s7] sm:$0xff] }
  0xe1   : > { %826 = vmatpush.msrb.mxu1 %v683_v58  ;;  %v1652_v58 = vld [vmem:[%s2999_s7 + $0x118] sm:$0xff] }
  0xe2   : > { %v587_v1 = vmax.f32 %v2335_v62, %v2337_v63  ;;  %v534_v30 = vpop.f32.mrf.mxu3  ;;  %v603_v63 = vld [vmem:[%s2996_s4] sm:$0xff] }
  0xe3   : > { %v540_v36 = vadd.f32 %v534_v30, %v432_v31  ;;  %827 = vmatpush.msrb.mxu1 %v682_v61  ;;  %v1575_v30 = vld [vmem:[%s2998_s6 + $0x60] sm:$0xff]  ;;  %v1651_v61 = vld [vmem:[%s2999_s7 + $0x110] sm:$0xff] }
  0xe4   : > { %v595_v57 = vadd.f32 %v1764_v45, %v587_v1  ;;  %v681_v1 = vld [vmem:[%s2998_s6 + $0x50] sm:$0xf]  ;;  %v1628_v31 = vld [vmem:[%s2999_s7 + $0xe0] sm:$0xff] }
  0xe6   : > { %v528_v2 = vpop.f32.mrf.mxu0  ;;  %v599_v62 = vmax.f32 %v595_v57, 0.0  ;;  %v1613_v57 = vld [vmem:[%s2998_s6 + $0xd8] sm:$0xff] }
  0xe7   : > { %v574_v3 = vpop.f32.mrf.mxu1  ;;  %v538_v33 = vadd.f32 %v528_v2, %v430_v23  ;;  %v1584_v2 = vld [vmem:[%s2998_s6 + $0xa8] sm:$0xf] }
  0xe8   : > { %v584_v34 = vadd.f32 %v574_v3, %v476_v24  ;;  %v1660_v3 = vld [vmem:[%s2999_s7 + $0x158] sm:$0xf]  ;;  %v672_v23 = vld [vmem:[%s2998_s6 + $0x8] sm:$0xff]  ;;  %v671_v24 = vld [vmem:[%s2998_s6] sm:$0xff] }
  0xe9   : > { %1661 = vmatpush.msk.msra.mxu1 %vm492_vm4, %v1660_v3  ;;  %v1640_v3 = vld [vmem:[%s2998_s6 + $0x128] sm:$0xff] }
  0xea   : > { %v588_v43 = vmax.f32 %v538_v33, %v584_v34  ;;  %v1658_v33 = vld [vmem:[%s2999_s7 + $0x148] sm:$0xff]  ;;  %v1574_v34 = vld [vmem:[%s2998_s6 + $0x58] sm:$0xff] }
  0xeb   : > { %990 = vmatpush.msra.mxu1 %v1659_v29  ;;  %v1673_v29 = vld [vmem:[%s2998_s6 + $0x1a8] sm:$0xff] }
  0xec   : > { %v596_v55 = vadd.f32 %v1764_v45, %v588_v43  ;;  %v1656_v43 = vld [vmem:[%s2999_s7 + $0x138] sm:$0xff] }
  0xed   : > { %991 = vmatpush.msra.mxu1 %v1658_v33  ;;  %v1672_v33 = vld [vmem:[%s2998_s6 + $0x1a0] sm:$0xff] }
  0xee   : > { %v531_v16 = vpop.f32.mrf.mxu0  ;;  %v600_v60 = vmax.f32 %v596_v55, 0.0  ;;  %v1614_v55 = vld [vmem:[%s2998_s6 + $0xe0] sm:$0xff] }
  0xef   : > { %v577_v10 = vpop.f32.mrf.mxu1  ;;  %v539_v27 = vadd.f32 %v531_v16, %v431_v20  ;;  %v1579_v16 = vld [vmem:[%s2998_s6 + $0x80] sm:$0xff]  ;;  %v1577_v20 = vld [vmem:[%s2998_s6 + $0x70] sm:$0xff] }
  0xf0   : > { %v585_v28 = vadd.f32 %v577_v10, %v477_v21  ;;  %v1581_v10 = vld [vmem:[%s2998_s6 + $0x90] sm:$0xff] }
  0xf1   : > { %v673_v21 = vld [vmem:[%s2998_s6 + $0x10] sm:$0xff] }
  0xf2   : > { %v589_v37 = vmax.f32 %v539_v27, %v585_v28  ;;  %v1629_v27 = vld [vmem:[%s2999_s7 + $0xe8] sm:$0xff]  ;;  %v1595_v28 = vld [vmem:[%s2999_s7 + $0x78] sm:$0xff] }
  0xf3   : > { %797 = vmatpush.msrb.mxu0 %v1595_v28  ;;  %v1682_v28 = vld [vmem:[%s2999_s7 + $0x180] sm:$0xff] }
  0xf4   : > { %v597_v49 = vadd.f32 %v1764_v45, %v589_v37  ;;  %v1657_v37 = vld [vmem:[%s2999_s7 + $0x140] sm:$0xff] }
  0xf5   : > { %992 = vmatpush.msra.mxu1 %v1657_v37  ;;  %v1679_v37 = vld [vmem:[%s2999_s7 + $0x168] sm:$0xff] }
  0xf6   : > { %v601_v39 = vmax.f32 %v597_v49, 0.0  ;;  %v1646_v49 = vld [vmem:[%s2998_s6 + $0x158] sm:$0xf] }
  0xf7   : > { %v580_v53 = vpop.f32.mrf.mxu1  ;;  %993 = vmatpush.msra.mxu1 %v1656_v43  ;;  %v1668_v43 = vld [vmem:[%s2998_s6 + $0x180] sm:$0xff] }
  0xf8   : > { %v586_v40 = vadd.f32 %v580_v53, %v478_v32  ;;  %v1594_v32 = vld [vmem:[%s2999_s7 + $0x70] sm:$0xff]  ;;  %v1593_v53 = vld [vmem:[%s2999_s7 + $0x68] sm:$0xff] }
  0xf9   : > { %798 = vmatpush.msrb.mxu0 %v1594_v32  ;;  %994 = vmatpush.msra.mxu1 %v1655_v47  ;;  %v1681_v32 = vld [vmem:[%s2999_s7 + $0x178] sm:$0xff]  ;;  %v1666_v47 = vld [vmem:[%s2998_s6 + $0x170] sm:$0xff] }
  0xfa   : > { %v590_v44 = vmax.f32 %v540_v36, %v586_v40  ;;  %v1618_v36 = vld [vmem:[%s2998_s6 + $0x100] sm:$0xf]  ;;  %v1626_v40 = vld [vmem:[%s2999_s7 + $0xd0] sm:$0xff] }
  0xfb   : > { %799 = vmatpush.msrb.mxu0 %v1593_v53  ;;  %995 = vmatpush.msra.mxu1 %v1654_v51  ;;  %v1680_v53 = vld [vmem:[%s2999_s7 + $0x170] sm:$0xff] }
  0xfc   : > { %v598_v48 = vadd.f32 %v1764_v45, %v590_v44  ;;  %v1625_v44 = vld [vmem:[%s2999_s7 + $0xc8] sm:$0xff]  ;;  %v1591_v45 = vld [vmem:[%s2999_s7 + $0x58] sm:$0xff] }
  0xfd   : > { %800 = vmatpush.msrb.mxu0 %v1592_v41  ;;  %996 = vmatpush.msra.mxu1 %v1653_v56  ;;  %v1678_v41 = vld [vmem:[%s2999_s7 + $0x160] sm:$0xff] }
  0xfe   : > { %v602_v54 = vmax.f32 %v598_v48, 0.0  ;;  %v1624_v48 = vld [vmem:[%s2999_s7 + $0xc0] sm:$0xff] }
  0xff   : > { %801 = vmatpush.msrb.mxu0 %v1591_v45  ;;  %997 = vmatpush.msra.mxu1 %v1652_v58  ;;  %v1667_v45 = vld [vmem:[%s2998_s6 + $0x178] sm:$0xff] }
 0x100   : > { %1568 = vmatpush.msk.msra.mxu2 %vm492_vm4, %v602_v54  ;;  %1571 = vmatpush.msk.msrb.mxu3 %vm492_vm4, %v602_v54  ;;  %v1645_v54 = vld [vmem:[%s2998_s6 + $0x150] sm:$0xff] }
 0x101   : > { %1647 = vmatpush.msk.msra.mxu0 %vm492_vm4, %v1646_v49  ;;  %998 = vmatpush.msra.mxu1 %v1651_v61  ;;  %v1665_v49 = vld [vmem:[%s2998_s6 + $0x168] sm:$0xff] }
 0x102   : > { %628 = vmatpush.msra.mxu2 %v601_v39  ;;  %659 = vmatpush.msrb.mxu3 %v601_v39  ;;  %v1644_v39 = vld [vmem:[%s2998_s6 + $0x148] sm:$0xff] }
 0x103   : > { %950 = vmatpush.msra.mxu0 %v1645_v54  ;;  %v1170_v61 = vld [vmem:[%s3003_s11 + $0x48] sm:$0xff] }
 0x104   : > { %629 = vmatpush.msra.mxu2 %v600_v60  ;;  %660 = vmatpush.msrb.mxu3 %v600_v60  ;;  %v1612_v60 = vld [vmem:[%s2998_s6 + $0xd0] sm:$0xff] }
 0x105   : > { %951 = vmatpush.msra.mxu0 %v1644_v39 }
 0x106   : > { %630 = vmatpush.msra.mxu2 %v599_v62  ;;  %661 = vmatpush.msrb.mxu3 %v599_v62  ;;  %v1642_v62 = vld [vmem:[%s2998_s6 + $0x138] sm:$0xff] }
 0x107   : > { %1569 = vmatmul.msk.f32.vlgmr.msra.gmra.mxu2 %vm605_vm5, %v603_v63  ;;  %1572 = vmatmul.msk.f32.vlgmr.msrb.gmra.mxu3 %vm605_vm5, %v638_v0  ;;  %v1611_v63 = vld [vmem:[%s2998_s6 + $0xc8] sm:$0xff] }
 0x108   : > { %1588 = vmatpush.msk.msra.mxu3 %vm492_vm4, %v681_v1  ;;  %1585 = vmatpush.msk.msrb.mxu2 %vm492_vm4, %v1584_v2  ;;  %v1650_v0 = vld [vmem:[%s2999_s7 + $0x108] sm:$0xff]  ;;  %v1641_v1 = vld [vmem:[%s2998_s6 + $0x130] sm:$0xff]  ;;  %v1610_v2 = vld [vmem:[%s2998_s6 + $0xc0] sm:$0xff] }
 0x109   : > { %952 = vmatpush.msra.mxu0 %v1643_v59  ;;  %999 = vmatpush.msra.mxu1 %v1650_v0 }
 0x10a   : > { %754 = vmatpush.msra.mxu3 %v680_v5  ;;  %724 = vmatpush.msrb.mxu2 %v1583_v6  ;;  %v1609_v5 = vld [vmem:[%s2998_s6 + $0xb8] sm:$0xff]  ;;  %v1639_v6 = vld [vmem:[%s2998_s6 + $0x120] sm:$0xff] }
 0x10b   : > { %953 = vmatpush.msra.mxu0 %v1642_v62  ;;  %v1169_v62 = vld [vmem:[%s3003_s11 + $0x40] sm:$0xff] }
 0x10c   : > { %755 = vmatpush.msra.mxu3 %v679_v7  ;;  %725 = vmatpush.msrb.mxu2 %v1582_v8  ;;  %v1608_v7 = vld [vmem:[%s2998_s6 + $0xb0] sm:$0xff]  ;;  %v1638_v8 = vld [vmem:[%s2998_s6 + $0x118] sm:$0xff] }
 0x10d   : > { %954 = vmatpush.msra.mxu0 %v1641_v1  ;;  %v1167_v1 = vld [vmem:[%s3003_s11 + $0x30] sm:$0xff] }
 0x10e   : > { %756 = vmatpush.msra.mxu3 %v678_v9  ;;  %726 = vmatpush.msrb.mxu2 %v1581_v10  ;;  %v1637_v9 = vld [vmem:[%s2998_s6 + $0x110] sm:$0xff]  ;;  %v1636_v10 = vld [vmem:[%s2998_s6 + $0x108] sm:$0xff] }
 0x10f   : > { %1570 = vmatmul.msk.f32.gmra.mxu2 %vm605_vm5, %v604_v11  ;;  %1573 = vmatmul.msk.f32.gmra.mxu3 %vm605_vm5, %v639_v12 }
 0x110   : > { %757 = vmatpush.msra.mxu3 %v677_v13  ;;  %727 = vmatpush.msrb.mxu2 %v1580_v14  ;;  %v1688_v14 = vld [vmem:[%s2999_s7 + $0x1b0] sm:$0xf] }
 0x111   : > { %955 = vmatpush.msra.mxu0 %v1640_v3 }
 0x112   : > { %758 = vmatpush.msra.mxu3 %v676_v15  ;;  %728 = vmatpush.msrb.mxu2 %v1579_v16  ;;  %v1687_v15 = vld [vmem:[%s2999_s7 + $0x1a8] sm:$0xff]  ;;  %v1686_v16 = vld [vmem:[%s2999_s7 + $0x1a0] sm:$0xff] }
 0x113   : > { %956 = vmatpush.msra.mxu0 %v1639_v6 }
 0x114   : > { %759 = vmatpush.msra.mxu3 %v675_v17  ;;  %729 = vmatpush.msrb.mxu2 %v1578_v18  ;;  %v1685_v17 = vld [vmem:[%s2999_s7 + $0x198] sm:$0xff] }
 0x115   : > { %957 = vmatpush.msra.mxu0 %v1638_v8 }
 0x116   : > { %760 = vmatpush.msra.mxu3 %v674_v19  ;;  %730 = vmatpush.msrb.mxu2 %v1577_v20 }
 0x117   : > { %958 = vmatpush.msra.mxu0 %v1637_v9  ;;  %v1164_v9 = vld [vmem:[%s3003_s11 + $0x18] sm:$0xff] }
 0x118   : > { %761 = vmatpush.msra.mxu3 %v673_v21  ;;  %731 = vmatpush.msrb.mxu2 %v1576_v22  ;;  %v1684_v21 = vld [vmem:[%s2999_s7 + $0x190] sm:$0xff] }
 0x119   : > { %959 = vmatpush.msra.mxu0 %v1636_v10 }
 0x11a   : > { %762 = vmatpush.msra.mxu3 %v672_v23  ;;  %732 = vmatpush.msrb.mxu2 %v1575_v30 }
 0x11c   : > { %763 = vmatpush.msra.mxu3 %v671_v24  ;;  %733 = vmatpush.msrb.mxu2 %v1574_v34  ;;  %v1683_v24 = vld [vmem:[%s2999_s7 + $0x188] sm:$0xff] }
 0x11e   : > { %1633 = vmatpush.msk.msrb.mxu3 %vm492_vm4, %v1632_v4  ;;  %1619 = vmatpush.msk.msra.mxu2 %vm492_vm4, %v1618_v36  ;;  %v1674_v4 = vld [vmem:[%s2998_s6 + $0x1b0] sm:$0xf]  ;;  %v1671_v36 = vld [vmem:[%s2998_s6 + $0x198] sm:$0xff] }
 0x120   : > { %903 = vmatpush.msrb.mxu3 %v1631_v25  ;;  %863 = vmatpush.msra.mxu2 %v1617_v42  ;;  %v1669_v42 = vld [vmem:[%s2998_s6 + $0x188] sm:$0xff] }
 0x122   : > { %904 = vmatpush.msrb.mxu3 %v1630_v26  ;;  %864 = vmatpush.msra.mxu2 %v1616_v46 }
 0x124   : > { %905 = vmatpush.msrb.mxu3 %v1629_v27  ;;  %865 = vmatpush.msra.mxu2 %v1615_v50  ;;  %v1664_v50 = vld [vmem:[%s2998_s6 + $0x160] sm:$0xff] }
 0x126   : > { %906 = vmatpush.msrb.mxu3 %v1628_v31  ;;  %866 = vmatpush.msra.mxu2 %v1614_v55 }
 0x128   : > { %907 = vmatpush.msrb.mxu3 %v1627_v35  ;;  %867 = vmatpush.msra.mxu2 %v1613_v57 }
 0x12a   : > { %908 = vmatpush.msrb.mxu3 %v1626_v40  ;;  %868 = vmatpush.msra.mxu2 %v1612_v60  ;;  %v1670_v40 = vld [vmem:[%s2998_s6 + $0x190] sm:$0xff] }
 0x12c   : > { %909 = vmatpush.msrb.mxu3 %v1625_v44  ;;  %869 = vmatpush.msra.mxu2 %v1611_v63  ;;  %v1168_v63 = vld [vmem:[%s3003_s11 + $0x38] sm:$0xff] }
 0x12e   : > { %910 = vmatpush.msrb.mxu3 %v1624_v48  ;;  %870 = vmatpush.msra.mxu2 %v1610_v2  ;;  %v1166_v2 = vld [vmem:[%s3003_s11 + $0x28] sm:$0xff] }
 0x130   : > { %911 = vmatpush.msrb.mxu3 %v1623_v52  ;;  %871 = vmatpush.msra.mxu2 %v1609_v5 }
 0x132   : > { %912 = vmatpush.msrb.mxu3 %v1622_v38  ;;  %872 = vmatpush.msra.mxu2 %v1608_v7  ;;  %v1165_v7 = vld [vmem:[%s3003_s11 + $0x20] sm:$0xff] }
 0x18a   : > { %v632_v11 = vpop.f32.mrf.mxu2  ;;  %v663_v12 = vpop.f32.mrf.mxu3 }
 0x18b   : > { %v2637_v13 = vmax.f32 %v632_v11, %v663_v12 }
 0x18d   : > { %1589 = vmatmul.msk.f32.vlgmr.msra.gmra.mxu3 %vm710_vm6, %v2637_v13  ;;  %1606 = vmatmul.msk.f32.vlgmr.msrb.gmra.mxu1 %vm710_vm6, %v2637_v13  ;;  %v707_v22 = vrot.slane %v2637_v13, 1  ;;  %v847_v30 = vrot.slane %v2637_v13, 2  ;;  %v934_v31 = vrot.slane %v2637_v13, 3  ;;  %v1021_v46 = vrot.slane %v2637_v13, 4  ;;  %v1163_v13 = vld [vmem:[%s3003_s11 + $0x10] sm:$0xff] }
 0x18e   : > { %1689 = vmatpush.msk.msra.mxu3 %vm492_vm4, %v1688_v14 }
 0x190   : > { %1077 = vmatpush.msra.mxu3 %v1687_v15 }
 0x192   : > { %v635_v18 = vpop.f32.mrf.mxu2  ;;  %v666_v19 = vpop.f32.mrf.mxu3  ;;  %1078 = vmatpush.msra.mxu3 %v1686_v16 }
 0x193   : > { %v670_v20 = vmax.f32 %v635_v18, %v666_v19 }
 0x194   : > { %1079 = vmatpush.msra.mxu3 %v1685_v17  ;;  %v1162_v17 = vld [vmem:[%s3003_s11 + $0x8] sm:$0xff] }
 0x195   : > { %1590 = vmatmul.msk.f32.gmra.mxu3 %vm710_vm6, %v670_v20  ;;  %1607 = vmatmul.msk.f32.gmra.mxu1 %vm710_vm6, %v670_v20  ;;  %v708_v23 = vrot.slane %v670_v20, 1  ;;  %v848_v26 = vrot.slane %v670_v20, 2  ;;  %v935_v27 = vrot.slane %v670_v20, 3  ;;  %v1022_v44 = vrot.slane %v670_v20, 4 }
 0x196   : > { %1080 = vmatpush.msra.mxu3 %v1684_v21  ;;  %v1161_v21 = vld [vmem:[%s3003_s11] sm:$0xff] }
 0x197   : > { %v709_v25 = vsel %vm109_vm0, %v707_v22, %v708_v23  ;;  %v849_v34 = vsel %vm276_vm2, %v847_v30, %v848_v26  ;;  %v936_v35 = vsel %vm384_vm3, %v934_v31, %v935_v27  ;;  %v1023_v48 = vsel %vm492_vm4, %v1021_v46, %v1022_v44  ;;  %v1738_v30 = vld [vmem:[%s3003_s11 + $0x180] sm:$0xff]  ;;  %v1706_v46 = vld [vmem:[%s3003_s11 + $0x98] sm:$0xff] }
 0x198   : > { %1586 = vmatmul.msk.f32.vlgmr.msrb.gmra.mxu2 %vm710_vm6, %v709_v25  ;;  %1603 = vmatmul.msk.f32.vlgmr.msrb.gmra.mxu0 %vm710_vm6, %v709_v25 }
 0x199   : > { %1081 = vmatpush.msra.mxu3 %v1683_v24  ;;  %1675 = vmatpush.msk.msrb.mxu2 %vm492_vm4, %v1674_v4  ;;  %v1739_v4 = vld [vmem:[%s3003_s11 + $0x188] sm:$0xff] }
 0x19b   : > { %1082 = vmatpush.msra.mxu3 %v1682_v28  ;;  %1037 = vmatpush.msrb.mxu2 %v1673_v29 }
 0x19d   : > { %1634 = vmatmul.msk.f32.vlgmr.msrb.gmra.mxu3 %vm710_vm6, %v849_v34  ;;  %1662 = vmatmul.msk.f32.vlgmr.msra.gmra.mxu1 %vm710_vm6, %v936_v35 }
 0x19e   : > { %1083 = vmatpush.msra.mxu3 %v1681_v32  ;;  %1038 = vmatpush.msrb.mxu2 %v1672_v33 }
 0x1a0   : > { %1587 = vmatmul.msk.f32.gmra.mxu2 %vm710_vm6, %v708_v23  ;;  %1604 = vmatmul.msk.f32.gmra.mxu0 %vm710_vm6, %v708_v23 }
 0x1a1   : > { %1084 = vmatpush.msra.mxu3 %v1680_v53  ;;  %1039 = vmatpush.msrb.mxu2 %v1671_v36  ;;  %v1737_v53 = vld [vmem:[%s3003_s11 + $0x178] sm:$0xff] }
 0x1a3   : > { %1085 = vmatpush.msra.mxu3 %v1679_v37  ;;  %1040 = vmatpush.msrb.mxu2 %v1670_v40  ;;  %v1736_v37 = vld [vmem:[%s3003_s11 + $0x170] sm:$0xff] }
 0x1a5   : > { %1635 = vmatmul.msk.f32.gmra.mxu3 %vm710_vm6, %v848_v26  ;;  %1663 = vmatmul.msk.f32.gmra.mxu1 %vm710_vm6, %v935_v27 }
 0x1a6   : > { %1086 = vmatpush.msra.mxu3 %v1678_v41  ;;  %1041 = vmatpush.msrb.mxu2 %v1669_v42 }
 0x1a8   : > { %1620 = vmatmul.msk.f32.vlgmr.msra.gmra.mxu2 %vm710_vm6, %v849_v34  ;;  %1648 = vmatmul.msk.f32.vlgmr.msra.gmra.mxu0 %vm710_vm6, %v936_v35  ;;  %v1765_v35 = vld [vmem:[%s3000_s8] ss:$0 sm:$0xff] }
 0x1a9   : > { %1042 = vmatpush.msrb.mxu2 %v1668_v43 }
 0x1ab   : > { %1043 = vmatpush.msrb.mxu2 %v1667_v45  ;;  %v1135_v45 = vld [vmem:[%s3002_s10] sm:$0x1f] }
 0x1ad   : > { %1690 = vmatmul.msk.f32.vlgmr.msra.gmra.mxu3 %vm710_vm6, %v1023_v48  ;;  %1044 = vmatpush.msrb.mxu2 %v1666_v47  ;;  %v1717_v47 = vld [vmem:[%s3003_s11 + $0xe8] sm:$0xff] }
 0x1af   : > { %1045 = vmatpush.msrb.mxu2 %v1665_v49  ;;  %v1716_v49 = vld [vmem:[%s3003_s11 + $0xe0] sm:$0xff] }
 0x1b0   : > { %1621 = vmatmul.msk.f32.gmra.mxu2 %vm710_vm6, %v848_v26  ;;  %1649 = vmatmul.msk.f32.gmra.mxu0 %vm710_vm6, %v935_v27 }
 0x1b1   : > { %1046 = vmatpush.msrb.mxu2 %v1664_v50  ;;  %v1704_v50 = vld [vmem:[%s3003_s11 + $0x88] sm:$0xff] }
 0x1b3   : > { %1181 = vmatpush.msra.mxu2 %v1170_v61  ;;  %v1713_v61 = vld [vmem:[%s3003_s11 + $0xc8] sm:$0xff] }
 0x1b5   : > { %1691 = vmatmul.msk.f32.gmra.mxu3 %vm710_vm6, %v1022_v44  ;;  %1182 = vmatpush.msra.mxu2 %v1169_v62  ;;  %v1712_v62 = vld [vmem:[%s3003_s11 + $0xc0] sm:$0xff] }
 0x1b7   : > { %1183 = vmatpush.msra.mxu2 %v1168_v63  ;;  %v1726_v63 = vld [vmem:[%s3003_s11 + $0x128] sm:$0xff] }
 0x1b8   : > { %1676 = vmatmul.msk.f32.vlgmr.msrb.gmra.mxu2 %vm710_vm6, %v1023_v48  ;;  %v1705_v48 = vld [vmem:[%s3003_s11 + $0x90] sm:$0xff] }
 0x1b9   : > { %1184 = vmatpush.msra.mxu2 %v1167_v1  ;;  %v1735_v1 = vld [vmem:[%s3003_s11 + $0x168] sm:$0xff] }
 0x1bb   : > { %1185 = vmatpush.msra.mxu2 %v1166_v2  ;;  %v1725_v2 = vld [vmem:[%s3003_s11 + $0x120] sm:$0xff] }
 0x1bd   : > { %1186 = vmatpush.msra.mxu2 %v1165_v7  ;;  %v1709_v7 = vld [vmem:[%s3003_s11 + $0xa8] sm:$0xff] }
 0x1bf   : > { %1187 = vmatpush.msra.mxu2 %v1164_v9  ;;  %v1723_v9 = vld [vmem:[%s3003_s11 + $0x110] sm:$0xff] }
 0x1c0   : > { %1677 = vmatmul.msk.f32.gmra.mxu2 %vm710_vm6, %v1022_v44  ;;  %v1106_v44 = vld [vmem:[%s3001_s9] sm:$0x1f] }
 0x1c1   : > { %1188 = vmatpush.msra.mxu2 %v1163_v13  ;;  %v1731_v13 = vld [vmem:[%s3003_s11 + $0x148] sm:$0xff] }
 0x1c3   : > { %1189 = vmatpush.msra.mxu2 %v1162_v17  ;;  %v1719_v17 = vld [vmem:[%s3003_s11 + $0xf0] sm:$0xff] }
 0x1c5   : > { %1190 = vmatpush.msra.mxu2 %v1161_v21  ;;  %v1348_v21 = vld [vmem:[%s3005_s13 + $0x58] sm:$0xff] }
 0x1c7   : > { %1321 = vmatpush.msrb.mxu2 %v1739_v4 }
 0x1c9   : > { %1322 = vmatpush.msrb.mxu2 %v1738_v30 }
 0x1cb   : > { %1323 = vmatpush.msrb.mxu2 %v1737_v53  ;;  %v1339_v53 = vld [vmem:[%s3005_s13 + $0x10] sm:$0xff] }
 0x1cd   : > { %1324 = vmatpush.msrb.mxu2 %v1736_v37  ;;  %v1337_v37 = vld [vmem:[%s3005_s13] sm:$0xff] }
 0x1cf   : > { %1325 = vmatpush.msrb.mxu2 %v1735_v1 }
 0x20a   : > { %v829_v55 = vpop.f32.mrf.mxu1 }
 0x210   : > { %v765_v51 = vpop.f32.mrf.mxu3 }
 0x212   : > { %v832_v58 = vpop.f32.mrf.mxu1 }
 0x215   : > { %v803_v56 = vpop.f32.mrf.mxu0 }
 0x216   : > { %v830_v10 = vadd.f32 %v829_v55, %v803_v56  ;;  %v1701_v55 = vld [vmem:[%s3003_s11 + $0x70] sm:$0xff]  ;;  %v1700_v56 = vld [vmem:[%s3003_s11 + $0x68] sm:$0xff] }
 0x218   : > { %v768_v52 = vpop.f32.mrf.mxu3 }
 0x21a   : > { %v1001_v3 = vpop.f32.mrf.mxu1 }
 0x21b   : > { %v735_v54 = vpop.f32.mrf.mxu2 }
 0x21c   : > { %v766_v8 = vadd.f32 %v765_v51, %v735_v54  ;;  %v1715_v51 = vld [vmem:[%s3003_s11 + $0xd8] sm:$0xff] }
 0x21d   : > { %v806_v59 = vpop.f32.mrf.mxu0  ;;  %v1702_v54 = vld [vmem:[%s3003_s11 + $0x78] sm:$0xff] }
 0x21e   : > { %v833_v14 = vadd.f32 %v832_v58, %v806_v59  ;;  %v1728_v58 = vld [vmem:[%s3003_s11 + $0x138] sm:$0xff]  ;;  %v1727_v59 = vld [vmem:[%s3003_s11 + $0x130] sm:$0xff] }
 0x220   : > { %v914_v38 = vpop.f32.mrf.mxu3 }
 0x221   : > { %v920_v15 = vadd.f32 %v914_v38, %v830_v10  ;;  %v1699_v38 = vld [vmem:[%s3003_s11 + $0x60] sm:$0xff]  ;;  %v1732_v10 = vld [vmem:[%s3003_s11 + $0x150] sm:$0xff] }
 0x222   : > { %v1004_v22 = vpop.f32.mrf.mxu1 }
 0x223   : > { %v738_v39 = vpop.f32.mrf.mxu2  ;;  %v1007_v23 = vadd.f32 %v1001_v3, %v920_v15  ;;  %v1710_v3 = vld [vmem:[%s3003_s11 + $0xb0] sm:$0xff]  ;;  %v1730_v15 = vld [vmem:[%s3003_s11 + $0x140] sm:$0xff] }
 0x224   : > { %v769_v16 = vadd.f32 %v768_v52, %v738_v39  ;;  %v1703_v52 = vld [vmem:[%s3003_s11 + $0x80] sm:$0xff]  ;;  %v1698_v39 = vld [vmem:[%s3003_s11 + $0x58] sm:$0xff] }
 0x225   : > { %v961_v5 = vpop.f32.mrf.mxu0 }
 0x228   : > { %v917_v60 = vpop.f32.mrf.mxu3 }
 0x229   : > { %v921_v18 = vadd.f32 %v917_v60, %v833_v14  ;;  %v1714_v60 = vld [vmem:[%s3003_s11 + $0xd0] sm:$0xff]  ;;  %v1721_v14 = vld [vmem:[%s3003_s11 + $0x100] sm:$0xff] }
 0x22b   : > { %v874_v57 = vpop.f32.mrf.mxu2  ;;  %v1008_v28 = vadd.f32 %v1004_v22, %v921_v18  ;;  %v1351_v18 = vld [vmem:[%s3005_s13 + $0x70] sm:$0xff] }
 0x22c   : > { %v880_v11 = vadd.f32 %v874_v57, %v766_v8  ;;  %v1697_v57 = vld [vmem:[%s3003_s11 + $0x50] sm:$0xff]  ;;  %v1733_v8 = vld [vmem:[%s3003_s11 + $0x158] sm:$0xff]  ;;  %1358 = vmatpush.msrb.mxu3 %v1351_v18 }
 0x22d   : > { %v964_v25 = vpop.f32.mrf.mxu0  ;;  %v1347_v22 = vld [vmem:[%s3005_s13 + $0x50] sm:$0xff] }
 0x22e   : > { %v967_v20 = vadd.f32 %v961_v5, %v880_v11  ;;  %v1734_v5 = vld [vmem:[%s3003_s11 + $0x160] sm:$0xff] }
 0x22f   : > { %1326 = vmatpush.msrb.mxu2 %v1734_v5  ;;  %v1708_v11 = vld [vmem:[%s3003_s11 + $0xa0] sm:$0xff] }
 0x230   : > { %v1088_v6 = vpop.f32.mrf.mxu3 }
 0x231   : > { %v1094_v27 = vadd.f32 %v1088_v6, %v1007_v23  ;;  %v1724_v6 = vld [vmem:[%s3003_s11 + $0x118] sm:$0xff]  ;;  %1327 = vmatpush.msrb.mxu2 %v1733_v8  ;;  %v1346_v23 = vld [vmem:[%s3005_s13 + $0x48] sm:$0xff] }
 0x233   : > { %v877_v0 = vpop.f32.mrf.mxu2  ;;  %1328 = vmatpush.msrb.mxu2 %v1732_v10 }
 0x234   : > { %v881_v19 = vadd.f32 %v877_v0, %v769_v16  ;;  %v1711_v0 = vld [vmem:[%s3003_s11 + $0xb8] sm:$0xff] }
 0x235   : > { %1329 = vmatpush.msrb.mxu2 %v1731_v13  ;;  %v1720_v16 = vld [vmem:[%s3003_s11 + $0xf8] sm:$0xff] }
 0x236   : > { %v968_v29 = vadd.f32 %v964_v25, %v881_v19  ;;  %v1350_v19 = vld [vmem:[%s3005_s13 + $0x68] sm:$0xff] }
 0x237   : > { %1330 = vmatpush.msrb.mxu2 %v1730_v15  ;;  %1359 = vmatpush.msrb.mxu3 %v1350_v19 }
 0x238   : > { %v1091_v26 = vpop.f32.mrf.mxu3 }
 0x239   : > { %v1095_v32 = vadd.f32 %v1091_v26, %v1008_v28 }
 0x23b   : > { %v1048_v12 = vpop.f32.mrf.mxu2 }
 0x23c   : > { %v1054_v24 = vadd.f32 %v1048_v12, %v967_v20  ;;  %v1722_v12 = vld [vmem:[%s3003_s11 + $0x108] sm:$0xff]  ;;  %v1349_v20 = vld [vmem:[%s3005_s13 + $0x60] sm:$0xff] }
 0x23d   : > { %1360 = vmatpush.msrb.mxu3 %v1349_v20 }
 0x23e   : > { %v1096_v33 = vmax.f32 %v1054_v24, %v1094_v27  ;;  %v1345_v24 = vld [vmem:[%s3005_s13 + $0x40] sm:$0xff] }
 0x23f   : > { %1361 = vmatpush.msrb.mxu3 %v1348_v21 }
 0x240   : > { %v1102_v41 = vadd.f32 %v1765_v35, %v1096_v33  ;;  %v1342_v33 = vld [vmem:[%s3005_s13 + $0x28] sm:$0xff] }
 0x241   : > { %1362 = vmatpush.msrb.mxu3 %v1347_v22 }
 0x242   : > { %v1104_v43 = vmax.f32 %v1102_v41, 0.0  ;;  %v1387_v41 = vld [vmem:[%s3007_s15 + $0x48] sm:$0xff] }
 0x243   : > { %v1051_v31 = vpop.f32.mrf.mxu2  ;;  %1363 = vmatpush.msrb.mxu3 %v1346_v23 }
 0x244   : > { %v1055_v34 = vadd.f32 %v1051_v31, %v968_v29  ;;  %v1344_v31 = vld [vmem:[%s3005_s13 + $0x38] sm:$0xff] }
 0x245   : > { %1364 = vmatpush.msrb.mxu3 %v1345_v24 }
 0x246   : > { %v1097_v36 = vmax.f32 %v1055_v34, %v1095_v32  ;;  %v1343_v32 = vld [vmem:[%s3005_s13 + $0x30] sm:$0xff]  ;;  %v1341_v34 = vld [vmem:[%s3005_s13 + $0x20] sm:$0xff] }
 0x247   : > { %1365 = vmatpush.msrb.mxu3 %v1344_v31 }
 0x248   : > { %v1103_v40 = vadd.f32 %v1765_v35, %v1097_v36  ;;  %v1340_v35 = vld [vmem:[%s3005_s13 + $0x18] sm:$0xff]  ;;  %v1338_v36 = vld [vmem:[%s3005_s13 + $0x8] sm:$0xff] }
 0x249   : > { %1366 = vmatpush.msrb.mxu3 %v1343_v32 }
 0x24a   : > { %v1105_v42 = vmax.f32 %v1103_v40, 0.0  ;;  %v1388_v40 = vld [vmem:[%s3007_s15 + $0x50] sm:$0xf] }
 0x24b   : > { %1367 = vmatpush.msrb.mxu3 %v1342_v33 }
 0x24c   : > { %1692 = vmatpush.msk.msrb.mxu0 %vm1111_vm7, %v1105_v42  ;;  %1694 = vmatpush.msk.msrb.mxu1 %vm1111_vm7, %v1105_v42  ;;  %v1386_v42 = vld [vmem:[%s3007_s15 + $0x40] sm:$0xff] }
 0x24d   : > { %1368 = vmatpush.msrb.mxu3 %v1341_v34 }
 0x24e   : > { %1130 = vmatpush.msrb.mxu0 %v1104_v43  ;;  %1154 = vmatpush.msrb.mxu1 %v1104_v43  ;;  %v1385_v43 = vld [vmem:[%s3007_s15 + $0x38] sm:$0xff] }
 0x24f   : > { %1693 = vmatmul.msk.f32.vlgmr.msrb.gmra.mxu0 %vm1107_vm8, %v1106_v44  ;;  %1695 = vmatmul.msk.f32.vlgmr.msrb.gmra.mxu1 %vm1107_vm8, %v1135_v45  ;;  %v1384_v44 = vld [vmem:[%s3007_s15 + $0x30] sm:$0xff]  ;;  %v1383_v45 = vld [vmem:[%s3007_s15 + $0x28] sm:$0xff] }
 0x250   : > { %1216 = vmatpush.msra.mxu1 %v1706_v46  ;;  %1251 = vmatpush.msra.mxu0 %v1717_v47  ;;  %v1382_v46 = vld [vmem:[%s3007_s15 + $0x20] sm:$0xff]  ;;  %v1381_v47 = vld [vmem:[%s3007_s15 + $0x18] sm:$0xff] }
 0x251   : > { %1369 = vmatpush.msrb.mxu3 %v1340_v35 }
 0x252   : > { %1217 = vmatpush.msra.mxu1 %v1705_v48  ;;  %1252 = vmatpush.msra.mxu0 %v1716_v49  ;;  %v1160_v49 = vld [vmem:[%s3004_s12] sm:$0x1] }
 0x253   : > { %1370 = vmatpush.msrb.mxu3 %v1339_v53 }
 0x254   : > { %1218 = vmatpush.msra.mxu1 %v1704_v50  ;;  %1253 = vmatpush.msra.mxu0 %v1715_v51 }
 0x255   : > { %1371 = vmatpush.msrb.mxu3 %v1338_v36 }
 0x256   : > { %1219 = vmatpush.msra.mxu1 %v1703_v52  ;;  %1254 = vmatpush.msra.mxu0 %v1714_v60  ;;  %v1379_v60 = vld [vmem:[%s3007_s15 + $0x8] sm:$0xff] }
 0x257   : > { %1372 = vmatpush.msrb.mxu3 %v1337_v37 }
 0x258   : > { %1220 = vmatpush.msra.mxu1 %v1702_v54  ;;  %1255 = vmatpush.msra.mxu0 %v1713_v61  ;;  %v1378_v61 = vld [vmem:[%s3007_s15] sm:$0xff] }
 0x25a   : > { %1221 = vmatpush.msra.mxu1 %v1701_v55  ;;  %1256 = vmatpush.msra.mxu0 %v1712_v62  ;;  %v1352_v62 = vld [vmem:[%s3006_s14] sm:$0x1] }
 0x25c   : > { %1222 = vmatpush.msra.mxu1 %v1700_v56  ;;  %1257 = vmatpush.msra.mxu0 %v1711_v0 }
 0x25e   : > { %1223 = vmatpush.msra.mxu1 %v1699_v38  ;;  %1258 = vmatpush.msra.mxu0 %v1710_v3 }
 0x260   : > { %1224 = vmatpush.msra.mxu1 %v1698_v39  ;;  %1259 = vmatpush.msra.mxu0 %v1709_v7 }
 0x262   : > { %1225 = vmatpush.msra.mxu1 %v1697_v57  ;;  %1260 = vmatpush.msra.mxu0 %v1708_v11 }
 0x264   : > { %1286 = vmatpush.msrb.mxu1 %v1728_v58  ;;  %1742 = vmatpush.msk.msrb.mxu0 %vm492_vm4, %v1388_v40 }
 0x266   : > { %1287 = vmatpush.msrb.mxu1 %v1727_v59  ;;  %1402 = vmatpush.msrb.mxu0 %v1387_v41  ;;  %v1380_v59 = vld [vmem:[%s3007_s15 + $0x10] sm:$0xff] }
 0x268   : > { %1288 = vmatpush.msrb.mxu1 %v1726_v63  ;;  %1403 = vmatpush.msrb.mxu0 %v1386_v42 }
 0x26a   : > { %1289 = vmatpush.msrb.mxu1 %v1725_v2  ;;  %1404 = vmatpush.msrb.mxu0 %v1385_v43  ;;  %v1389_v2 = vld [vmem:[%s3008_s16] sm:$0x1] }
 0x26c   : > { %1290 = vmatpush.msrb.mxu1 %v1724_v6  ;;  %1405 = vmatpush.msrb.mxu0 %v1384_v44 }
 0x26e   : > { %1291 = vmatpush.msrb.mxu1 %v1723_v9  ;;  %1406 = vmatpush.msrb.mxu0 %v1383_v45 }
 0x270   : > { %1292 = vmatpush.msrb.mxu1 %v1722_v12  ;;  %1407 = vmatpush.msrb.mxu0 %v1382_v46 }
 0x272   : > { %1293 = vmatpush.msrb.mxu1 %v1721_v14  ;;  %1408 = vmatpush.msrb.mxu0 %v1381_v47 }
 0x274   : > { %1294 = vmatpush.msrb.mxu1 %v1720_v16  ;;  %1409 = vmatpush.msrb.mxu0 %v1380_v59 }
 0x276   : > { %1295 = vmatpush.msrb.mxu1 %v1719_v17  ;;  %1410 = vmatpush.msrb.mxu0 %v1379_v60 }
 0x278   : > { %1411 = vmatpush.msrb.mxu0 %v1378_v61 }
 0x2cc   : > { %v1132_v4 = vpop.f32.mrf.mxu0  ;;  %v1156_v25 = vpop.f32.mrf.mxu1 }
 0x2cd   : > { %v1159_v26 = vmax.f32 %v1132_v4, %v1156_v25 }
 0x2cf   : > { %1696 = vmatmul.msk.f32.vlgmr.msra.gmra.mxu2 %vm1171_vm9, %v1159_v26  ;;  %v1207_v27 = vrot.slane %v1159_v26, 1  ;;  %v1242_v28 = vrot.slane %v1159_v26, 2  ;;  %v1312_v29 = vrot.slane %v1159_v26, 4  ;;  %v1277_v30 = vrot.slane %v1159_v26, 3 }
 0x2d1   : > { %1707 = vmatmul.msk.f32.vlgmr.msra.gmra.mxu1 %vm1171_vm9, %v1207_v27  ;;  %1718 = vmatmul.msk.f32.vlgmr.msra.gmra.mxu0 %vm1171_vm9, %v1242_v28 }
 0x2d7   : > { %1740 = vmatmul.msk.f32.vlgmr.msrb.gmra.mxu2 %vm1171_vm9, %v1312_v29 }
 0x2d9   : > { %1729 = vmatmul.msk.f32.vlgmr.msrb.gmra.mxu1 %vm1171_vm9, %v1277_v30 }
 0x34e   : > { %v1227_v48 = vpop.f32.mrf.mxu1  ;;  %v1262_v54 = vpop.f32.mrf.mxu0 }
 0x352   : > { %v1192_v50 = vpop.f32.mrf.mxu2 }
 0x353   : > { %v1195_v51 = vadd.f32 %v1192_v50, %v1160_v49 }
 0x355   : > { %v1230_v52 = vadd.f32 %v1227_v48, %v1195_v51 }
 0x356   : > { %v1297_v56 = vpop.f32.mrf.mxu1 }
 0x357   : > { %v1265_v55 = vadd.f32 %v1262_v54, %v1230_v52 }
 0x359   : > { %v1300_v38 = vadd.f32 %v1297_v56, %v1265_v55 }
 0x35a   : > { %v1332_v39 = vpop.f32.mrf.mxu2 }
 0x35b   : > { %v1335_v57 = vadd.f32 %v1332_v39, %v1300_v38 }
 0x35d   : > { %v1336_v58 = vmax.f32 %v1335_v57, 0.0 }
 0x35f   : > { %1741 = vmatmul.msk.f32.vlgmr.msrb.gmra.mxu3 %vm1353_vm10, %v1336_v58 }
 0x3e2   : > { %v1374_v63 = vpop.f32.mrf.mxu3 }
 0x3e3   : > { %v1375_v0 = vadd.f32 %v1374_v63, %v1352_v62 }
 0x3e5   : > { %v1377_v1 = vmax.f32 %v1375_v0, 0.0 }
 0x3e7   : > { %1743 = vmatmul.msk.f32.vlgmr.msrb.gmra.mxu0 %vm710_vm6, %v1377_v1 }
 0x463   :  { %60 = sbr.rel (!%p58_p0) target bundleno = 3 (0x3), region = 117 }
 0x464   : > { %v1413_v3 = vpop.f32.mrf.mxu0 }
 0x465   : > { %v1414_v5 = vadd.f32 %v1413_v3, %v1389_v2 }
 0x467   : > { %1418 = vst.msk [vmem:[%s1416_s20] sm:$0x1] %vm1417_vm11, %v1414_v5 }

</bundles_post_ra>
